<compile_context>
chip_gen: v7x
topology: tpu7x:2x2x1
jax: 0.10.0
libtpu: 0.0.40
codegen_flags: <defaults>
</compile_context>

<pallas_src>
import functools

import jax
import jax.numpy as jnp
import numpy as np
from jax.experimental import pallas as pl
from jax.experimental.pallas import tpu as pltpu


def _round_up(x, m):
    return ((x + m - 1) // m) * m


def _choose_tile_nc(NC, HW):
    """Rows per tile so one input block ~= 4 MiB; total live VMEM ~= 5x block
    (double-buffered input + clamp/square/precision-split temporaries) stays
    ~20-25 MiB, safely under v7x's 64 MiB physical VMEM and inside the 48 MiB
    scoped limit on every generation."""
    target_block_bytes = 4 * 1024 * 1024
    rows = target_block_bytes // (HW * 4)
    rows = max(8, (rows // 8) * 8)          # multiple of 8 sublanes
    rows = min(rows, 4096)                  # MXU M-efficiency saturates long before this
    tile = min(rows, _round_up(NC, 8))
    # v7x megacore: guarantee >=2 grid steps on the "parallel" axis when the
    # problem is splittable, so both TensorCores get work.
    if pl.cdiv(max(NC, 1), tile) < 2 and NC > 8:
        tile = max(8, _round_up(pl.cdiv(NC, 2), 8))
    return tile


def _aggregator_kernel(x_ref, pe_ref, po_ref, out_ref, *, bessel, eps):
    # x_ref:   (tile_nc, H*W)          lane-dense input rows
    # pe_ref:  (H*W, 2L)  mean  window weights (1/k^2) in even columns, 0 in odd
    # po_ref:  (H*W, 2L)  window weights (1/k^2) in odd columns, 0 in even
    # out_ref: (tile_nc, 2L)  interleaved [mean_p, var_p]
    xc = jnp.maximum(x_ref[...], eps)                          # clamp(min=eps), VPU
    pe = pe_ref[...]
    po = po_ref[...]
    hi = jax.lax.Precision.HIGHEST
    # Pooling as skinny MXU matmuls (HBM-bound kernel; MXU has huge slack).
    mean_even = jnp.dot(xc, pe, preferred_element_type=jnp.float32,
                        precision=hi)                          # m_p at col 2p, 0 at odd
    mean_odd = jnp.dot(xc, po, preferred_element_type=jnp.float32,
                       precision=hi)                           # m_p at col 2p+1, 0 at even
    mean2_odd = jnp.dot(xc * xc, po, preferred_element_type=jnp.float32,
                        precision=hi)                          # E[x^2]_p at col 2p+1
    # var lands on odd columns (even columns are exactly 0 there); mean on even.
    out_ref[...] = mean_even + (mean2_odd - mean_odd * mean_odd) * bessel


def _build_pool_matrices(H, W, k, s, Ho, Wo):
    """Two (H*W, 2*Ho*Wo) matrices with 1/k^2 membership weights.
    Pe scatters window p's average into output column 2p (mean slots);
    Po scatters it into column 2p+1 (variance slots)."""
    L = Ho * Wo
    Pe = np.zeros((H * W, 2 * L), dtype=np.float32)
    Po = np.zeros((H * W, 2 * L), dtype=np.float32)
    inv_area = 1.0 / float(k * k)
    for oi in range(Ho):
        for oj in range(Wo):
            p = oi * Wo + oj
            for di in range(k):
                for dj in range(k):
                    r = (oi * s + di) * W + (oj * s + dj)
                    Pe[r, 2 * p] = inv_area
                    Po[r, 2 * p + 1] = inv_area
    return jnp.asarray(Pe), jnp.asarray(Po)


def my_aggregator(x, eps=1e-6):
    """x: (N, C, H, W) float32 -> (N, C*Ho*Wo*2) float32."""
    N, C, H, W = x.shape
    if H < 2:
        raise ValueError("MyAggregator requires H >= 2 (kernel_size = H//2+1 needs k >= 2).")
    k = H // 2 + 1
    s = H // 2
    if W < k:
        raise ValueError(f"MyAggregator requires W >= kernel_size ({k}); got W={W}.")
    Ho = (H - k) // s + 1
    Wo = (W - k) // s + 1
    L = Ho * Wo
    HW = H * W
    NC = N * C

    # Pure metadata reshape -- no pad, no extra HBM copy.
    x_flat = x.reshape(NC, HW).astype(jnp.float32)
    pe, po = _build_pool_matrices(H, W, k, s, Ho, Wo)

    tile_nc = _choose_tile_nc(NC, HW)
    num_tiles = pl.cdiv(NC, tile_nc)

    bessel = float(k * k) / float(k * k - 1)
    kernel = functools.partial(_aggregator_kernel, bessel=bessel, eps=float(eps))

    cost = pl.CostEstimate(
        flops=3 * 2 * NC * HW * (2 * L) + 4 * NC * HW,
        transcendentals=0,
        bytes_accessed=NC * HW * 4 + NC * 2 * L * 4 + 2 * (HW * 2 * L * 4),
    )

    out = pl.pallas_call(
        kernel,
        out_shape=jax.ShapeDtypeStruct((NC, 2 * L), jnp.float32),
        grid=(num_tiles,),
        in_specs=[
            pl.BlockSpec((tile_nc, HW), lambda i: (i, 0)),     # streamed input rows
            pl.BlockSpec((HW, 2 * L), lambda i: (0, 0)),       # constant pooling matrix (mean)
            pl.BlockSpec((HW, 2 * L), lambda i: (0, 0)),       # constant pooling matrix (mean2)
        ],
        out_specs=pl.BlockSpec((tile_nc, 2 * L), lambda i: (i, 0)),
        compiler_params=pltpu.CompilerParams(
            dimension_semantics=("parallel",),
            vmem_limit_bytes=48 * 1024 * 1024,
        ),
        cost_estimate=cost,
    )(x_flat, pe, po)

    # Rows are (n, c) in row-major order and already interleaved [m_p, v_p],
    # so this is a free reshape matching PyTorch's flatten(1).
    return out.reshape(N, C * L * 2)


def _reference_numpy(x, eps=1e-6):
    # Pure-numpy reference mirroring the PyTorch module.
    N, C, H, W = x.shape
    k = H // 2 + 1
    s = H // 2
    Ho = (H - k) // s + 1
    Wo = (W - k) // s + 1
    xc = np.maximum(x, eps)
    rows = []
    for n in range(N):
        per_c = []
        for c in range(C):
            vals = []
            for oi in range(Ho):
                for oj in range(Wo):
                    win = xc[n, c, oi * s: oi * s + k, oj * s: oj * s + k]
                    m = win.mean()
                    m2 = (win ** 2).mean()
                    v = (m2 - m * m) * (k * k) / (k * k - 1)
                    vals.extend([m, v])
            per_c.append(np.asarray(vals, dtype=np.float32))
        rows.append(np.concatenate(per_c))
    return np.stack(rows, axis=0)


if __name__ == "__main__":
    key = jax.random.PRNGKey(0)
    N, C, H, W = 2, 4, 16, 16
    x = jax.random.uniform(key, (N, C, H, W), dtype=jnp.float32, minval=-1.0, maxval=1.0)

    out = my_aggregator(x)
    out = jax.block_until_ready(out)

    ref = _reference_numpy(np.asarray(x))
    np.testing.assert_allclose(np.asarray(out), ref, rtol=2e-5, atol=2e-5)
    print("KERNEL_OK")
</pallas_src>

<mosaic_0001>
module attributes {stable_mosaic.version = 11 : i64} {
  func.func @_aggregator_kernel(%arg0: i32, %arg1: memref<8x256xf32, #tpu.memory_space<vmem>>, %arg2: memref<256x2xf32, #tpu.memory_space<vmem>>, %arg3: memref<256x2xf32, #tpu.memory_space<vmem>>, %arg4: memref<8x2xf32, #tpu.memory_space<vmem>>) attributes {dimension_semantics = [#tpu.dimension_semantics<parallel>], iteration_bounds = array<i64: 1>, scalar_prefetch = 0 : i64, scratch_operands = 0 : i64, tpu.core_type = #tpu.core_type<tc>, window_params = [{transform_indices = @transform_0, window_bounds = array<i64: 8, 256>}, {pipeline_mode = #tpu.pipeline_mode<synchronous>, transform_indices = @transform_1, window_bounds = array<i64: 256, 2>}, {pipeline_mode = #tpu.pipeline_mode<synchronous>, transform_indices = @transform_2, window_bounds = array<i64: 256, 2>}, {transform_indices = @transform_3, window_bounds = array<i64: 8, 2>}]} {
    %c0 = arith.constant 0 : index
    %c0_0 = arith.constant 0 : index
    %0 = vector.load %arg1[%c0, %c0_0] : memref<8x256xf32, #tpu.memory_space<vmem>>, vector<8x256xf32>
    %cst = arith.constant 9.99999997E-7 : f32
    %1 = vector.broadcast %cst : f32 to vector<8x256xf32>
    %2 = arith.maximumf %0, %1 : vector<8x256xf32>
    %c0_1 = arith.constant 0 : index
    %c0_2 = arith.constant 0 : index
    %3 = vector.load %arg2[%c0_1, %c0_2] : memref<256x2xf32, #tpu.memory_space<vmem>>, vector<256x2xf32>
    %c0_3 = arith.constant 0 : index
    %c0_4 = arith.constant 0 : index
    %4 = vector.load %arg3[%c0_3, %c0_4] : memref<256x2xf32, #tpu.memory_space<vmem>>, vector<256x2xf32>
    %cst_5 = arith.constant dense<0.000000e+00> : vector<8x2xf32>
    %5 = tpu.matmul %2, %3, %cst_5 {dimension_numbers = #tpu.dot_dimension_numbers<[1], [0], [0], [1], [0, 0, 1, 1], [], []>, precision = #tpu.contract_precision<fp32>} : vector<8x256xf32>, vector<256x2xf32>, vector<8x2xf32> -> vector<8x2xf32>
    %cst_6 = arith.constant dense<0.000000e+00> : vector<8x2xf32>
    %6 = tpu.matmul %2, %4, %cst_6 {dimension_numbers = #tpu.dot_dimension_numbers<[1], [0], [0], [1], [0, 0, 1, 1], [], []>, precision = #tpu.contract_precision<fp32>} : vector<8x256xf32>, vector<256x2xf32>, vector<8x2xf32> -> vector<8x2xf32>
    %7 = arith.mulf %2, %2 : vector<8x256xf32>
    %cst_7 = arith.constant dense<0.000000e+00> : vector<8x2xf32>
    %8 = tpu.matmul %7, %4, %cst_7 {dimension_numbers = #tpu.dot_dimension_numbers<[1], [0], [0], [1], [0, 0, 1, 1], [], []>, precision = #tpu.contract_precision<fp32>} : vector<8x256xf32>, vector<256x2xf32>, vector<8x2xf32> -> vector<8x2xf32>
    %9 = arith.mulf %6, %6 : vector<8x2xf32>
    %10 = arith.subf %8, %9 : vector<8x2xf32>
    %cst_8 = arith.constant 1.012500e+00 : f32
    %11 = vector.broadcast %cst_8 : f32 to vector<8x2xf32>
    %12 = arith.mulf %10, %11 : vector<8x2xf32>
    %13 = arith.addf %5, %12 : vector<8x2xf32>
    %c0_9 = arith.constant 0 : index
    %c0_10 = arith.constant 0 : index
    %14 = vector.load %arg4[%c0_9, %c0_10] : memref<8x2xf32, #tpu.memory_space<vmem>>, vector<8x2xf32>
    tpu.vector_store %arg4[%c0_9, %c0_10], %13 {strides = array<i32>} : memref<8x2xf32, #tpu.memory_space<vmem>>, vector<8x2xf32>,
    return
  }
  func.func @transform_0(%arg0: i32) -> (i32, i32) {
    %c0_i32 = arith.constant 0 : i32
    %c0_i32_0 = arith.constant 0 : i32
    return %arg0, %c0_i32 : i32, i32
  }
  func.func @transform_1(%arg0: i32) -> (i32, i32) {
    %c0_i32 = arith.constant 0 : i32
    %c0_i32_0 = arith.constant 0 : i32
    %c0_i32_1 = arith.constant 0 : i32
    return %c0_i32, %c0_i32_0 : i32, i32
  }
  func.func @transform_2(%arg0: i32) -> (i32, i32) {
    %c0_i32 = arith.constant 0 : i32
    %c0_i32_0 = arith.constant 0 : i32
    %c0_i32_1 = arith.constant 0 : i32
    return %c0_i32, %c0_i32_0 : i32, i32
  }
  func.func @transform_3(%arg0: i32) -> (i32, i32) {
    %c0_i32 = arith.constant 0 : i32
    %c0_i32_0 = arith.constant 0 : i32
    return %arg0, %c0_i32 : i32, i32
  }
}

</mosaic_0001>

<bundles_post_ra>
// kernel: tpu_custom_call.1
= control target key start
LH: loop header
LB: loop body
LE: loop exit
PB: predicated region body
PF: predicated region fallthrough
CT: control target
= control target key end

     0   :  { %vm2673_vm0 = vcmask 15360   ;;  %s5402_s2 = inlined_call_operand.vmem [shape: f32[256,2], index: 2, kind: input, shape index: {}]   ;;  %s5403_s0 = inlined_call_operand.vmem [shape: f32[8,256], index: 0, kind: input, shape index: {}]   ;;  %s5404_s1 = inlined_call_operand.vmem [shape: f32[256,2], index: 1, kind: input, shape index: {}]   ;;  %s5405_s3 = inlined_call_operand.vmem [shape: f32[8,2], index: 3, kind: output, shape index: {}]  }
   0x1   :  { %v66_v0 = vld [vmem:[%s5402_s2 + $0x80] sm:$0xff]  ;;  %v67_v1 = vld [vmem:[%s5402_s2 + $0x88] sm:$0xff]  ;;  %v68_v7 = vld [vmem:[%s5402_s2 + $0x90] sm:$0xff] }
   0x2   :  { %v50_v2 = vld [vmem:[%s5402_s2] sm:$0xff]  ;;  %v131_v3 = vand.u32 4294901760, %v66_v0  ;;  %v134_v4 = vand.u32 4294901760, %v67_v1  ;;  %v51_v5 = vld [vmem:[%s5402_s2 + $0x8] sm:$0xff]  ;;  %v69_v8 = vld [vmem:[%s5402_s2 + $0x98] sm:$0xff]  ;;  %v137_v10 = vand.u32 4294901760, %v68_v7 }
   0x3   :  { %v83_v6 = vand.u32 4294901760, %v50_v2  ;;  %v86_v9 = vand.u32 4294901760, %v51_v5  ;;  %v140_v11 = vand.u32 4294901760, %v69_v8  ;;  %v52_v12 = vld [vmem:[%s5402_s2 + $0x10] sm:$0xff]  ;;  %v53_v13 = vld [vmem:[%s5402_s2 + $0x18] sm:$0xff]  ;;  %v3932_v14 = vld [vmem:[%s5402_s2 + $0xa0] sm:$0xff] }
   0x4   :  { %v3934_v15 = vpack.c.bf16 %v134_v4, %v131_v3  ;;  %v89_v16 = vand.u32 4294901760, %v52_v12  ;;  %v92_v17 = vand.u32 4294901760, %v53_v13  ;;  %v3939_v18 = vld [vmem:[%s5402_s2 + $0xa8] sm:$0xff]  ;;  %v143_v19 = vand.u32 4294901760, %v3932_v14  ;;  %v3945_v20 = vld [vmem:[%s5402_s2 + $0x20] sm:$0xff]  ;;  %v3962_v26 = vld [vmem:[%s5402_s2 + $0xb0] sm:$0xff] }
   0x5   :  { %v3950_v21 = vld [vmem:[%s5402_s2 + $0x28] sm:$0xff]  ;;  %v3952_v22 = vpack.c.bf16 %v86_v9, %v83_v6  ;;  %v3954_v23 = vpack.c.bf16 %v140_v11, %v137_v10  ;;  %v146_v24 = vand.u32 4294901760, %v3939_v18  ;;  %v3957_v25 = vsub.f32 %v66_v0, %v131_v3  ;;  %v3967_v27 = vld [vmem:[%s5402_s2 + $0xb8] sm:$0xff]  ;;  %v3991_v36 = vld [vmem:[%s5402_s2 + $0x30] sm:$0xff] }
   0x6   :  { %3310 = vmatprep.subr.bf16.mxu0 %v3934_v15  ;;  %v3970_v28 = vpack.c.bf16 %v92_v17, %v89_v16  ;;  %v3972_v29 = vsub.f32 %v67_v1, %v134_v4  ;;  %v95_v30 = vand.u32 4294901760, %v3945_v20  ;;  %v98_v31 = vand.u32 4294901760, %v3950_v21  ;;  %v4013_v45 = vld [vmem:[%s5402_s2 + $0x38] sm:$0xff]  ;;  %v4043_v58 = vld [vmem:[%s5402_s2 + $0xc0] sm:$0xff]  ;;  %v4053_v63 = vld [vmem:[%s5402_s2 + $0xc8] sm:$0xff] }
   0x7   :  { %3312 = vmatpush3.bf16.msra.mxu0 %v3952_v22  ;;  %v3981_v32 = vpack.c.bf16 %v146_v24, %v143_v19  ;;  %v5419_v33 = vand.u32 4294901760, %v3957_v25  ;;  %v3984_v34 = vsub.f32 %v50_v2, %v83_v6  ;;  %v3986_v35 = vsub.f32 %v51_v5, %v86_v9  ;;  %v4070_v4 = vld [vmem:[%s5402_s2 + $0x40] sm:$0xff]  ;;  %v4075_v5 = vld [vmem:[%s5402_s2 + $0x48] sm:$0xff] }
   0x8   :  { %3314 = vmatprep.subr.bf16.mxu0 %v3954_v23  ;;  %v5418_v37 = vand.u32 4294901760, %v3972_v29  ;;  %v3999_v38 = vpack.c.bf16 %v98_v31, %v95_v30  ;;  %v149_v39 = vand.u32 4294901760, %v3962_v26  ;;  %v152_v40 = vand.u32 4294901760, %v3967_v27 }
   0x9   :  { %v310_v41 = vsub.f32 %v3957_v25, %v5419_v33  ;;  %v5415_v42 = vand.u32 4294901760, %v3984_v34  ;;  %v5414_v43 = vand.u32 4294901760, %v3986_v35  ;;  %v4008_v44 = vsub.f32 %v68_v7, %v137_v10 }
   0xa   :  { %v317_v46 = vsub.f32 %v3972_v29, %v5418_v37  ;;  %v4022_v47 = vpack.c.bf16 %v152_v40, %v149_v39  ;;  %v4024_v48 = vsub.f32 %v69_v8, %v140_v11  ;;  %v101_v49 = vand.u32 4294901760, %v3991_v36 }
   0xb   :  { %3316 = vmatpush3.bf16.msra.mxu0 %v3970_v28  ;;  %v311_v50 = vand.u32 4294901760, %v310_v41  ;;  %v198_v51 = vsub.f32 %v3984_v34, %v5415_v42  ;;  %v205_v52 = vsub.f32 %v3986_v35, %v5414_v43  ;;  %v5413_v53 = vand.u32 4294901760, %v4008_v44 }
   0xc   :  { %3318 = vmatprep.subr.bf16.mxu0 %v3981_v32  ;;  %v318_v54 = vand.u32 4294901760, %v317_v46  ;;  %v5412_v55 = vand.u32 4294901760, %v4024_v48  ;;  %v104_v56 = vand.u32 4294901760, %v4013_v45  ;;  %v4038_v57 = vsub.f32 %v52_v12, %v89_v16 }
   0xd   :  { %v199_v59 = vand.u32 4294901760, %v198_v51  ;;  %v206_v60 = vand.u32 4294901760, %v205_v52  ;;  %v324_v61 = vsub.f32 %v4008_v44, %v5413_v53  ;;  %v4048_v62 = vsub.f32 %v53_v13, %v92_v17 }
   0xe   :  { %v4055_v0 = vpack.c.bf16 %v318_v54, %v311_v50  ;;  %v331_v1 = vsub.f32 %v4024_v48, %v5412_v55  ;;  %v4064_v2 = vpack.c.bf16 %v104_v56, %v101_v49  ;;  %v5409_v3 = vand.u32 4294901760, %v4038_v57 }
   0xf   :  { %3320 = vmatpush3.bf16.msra.mxu0 %v3999_v38  ;;  %v4078_v6 = vpack.c.bf16 %v206_v60, %v199_v59  ;;  %v325_v7 = vand.u32 4294901760, %v324_v61  ;;  %v5408_v8 = vand.u32 4294901760, %v4048_v62  ;;  %v155_v9 = vand.u32 4294901760, %v4043_v58 }
  0x10   :  { %5520 = vst [vmem:[#allocation2_spill] sm:$0xff] %v4055_v0  ;;  %3342 = vmatprep.subr.bf16.mxu1 %v4055_v0  ;;  %3322 = vmatprep.subr.bf16.mxu0 %v4022_v47  ;;  %v332_v10 = vand.u32 4294901760, %v331_v1  ;;  %v212_v11 = vsub.f32 %v4038_v57, %v5409_v3  ;;  %v158_v12 = vand.u32 4294901760, %v4053_v63  ;;  %v4091_v13 = vsub.f32 %v3932_v14, %v143_v19  ;;  %v4107_v14 = vld [vmem:[%s5402_s2 + $0xd0] sm:$0xff]  ;;  %v4112_v19 = vld [vmem:[%s5402_s2 + $0xd8] sm:$0xff] }
  0x11   :  { %5521 = vst [vmem:[#allocation3_spill] sm:$0xff] %v4078_v6  ;;  %3344 = vmatpush3.bf16.msra.mxu1 %v4078_v6  ;;  %v219_v16 = vsub.f32 %v4048_v62, %v5408_v8  ;;  %v4100_v17 = vsub.f32 %v3939_v18, %v146_v24  ;;  %v107_v41 = vand.u32 4294901760, %v4070_v4  ;;  %v110_v46 = vand.u32 4294901760, %v4075_v5 }
  0x12   :  { %v4114_v50 = vpack.c.bf16 %v332_v10, %v325_v7  ;;  %v213_v51 = vand.u32 4294901760, %v212_v11  ;;  %v4120_v18 = vpack.c.bf16 %v158_v12, %v155_v9  ;;  %v5406_v24 = vand.u32 4294901760, %v4091_v13 }
  0x13   :  { %3324 = vmatpush3.bf16.msra.mxu0 %v4064_v2  ;;  %v220_v52 = vand.u32 4294901760, %v219_v16  ;;  %v5407_v54 = vand.u32 4294901760, %v4100_v17  ;;  %v4129_v59 = vpack.c.bf16 %v110_v46, %v107_v41  ;;  %v4134_v60 = vsub.f32 %v3945_v20, %v95_v30  ;;  %v4151_v20 = vld [vmem:[%s5402_s2 + $0x50] sm:$0xff] }
  0x14   :  { %5522 = vst [vmem:[#allocation4_spill] sm:$0xff] %v4114_v50  ;;  %3346 = vmatprep.subr.bf16.mxu1 %v4114_v50  ;;  %3326 = vmatprep.subr.bf16.mxu0 %v4120_v18  ;;  %v338_v61 = vsub.f32 %v4091_v13, %v5406_v24  ;;  %v4144_v1 = vsub.f32 %v3950_v21, %v98_v31  ;;  %v5430_v7 = vand.u32 4294901760, %v4107_v14  ;;  %v5426_v10 = vand.u32 4294901760, %v4112_v19  ;;  %v4167_v31 = vld [vmem:[%s5402_s2 + $0x58] sm:$0xff] }
  0x15   :  { %v4153_v30 = vpack.c.bf16 %v220_v52, %v213_v51  ;;  %v345_v11 = vsub.f32 %v4100_v17, %v5407_v54  ;;  %v5410_v16 = vand.u32 4294901760, %v4134_v60  ;;  %v4162_v21 = vsub.f32 %v3962_v26, %v149_v39 }
  0x16   :  { %v339_v24 = vand.u32 4294901760, %v338_v61  ;;  %v5411_v51 = vand.u32 4294901760, %v4144_v1  ;;  %v4174_v52 = vpack.c.bf16 %v5426_v10, %v5430_v7  ;;  %v4179_v54 = vsub.f32 %v3967_v27, %v152_v40 }
  0x17   :  { %5523 = vst [vmem:[#allocation5_spill] sm:$0xff] %v4153_v30  ;;  %3348 = vmatpush3.bf16.msra.mxu1 %v4153_v30  ;;  %v346_v26 = vand.u32 4294901760, %v345_v11  ;;  %3328 = vmatpush3.bf16.msra.mxu0 %v4129_v59  ;;  %v226_v39 = vsub.f32 %v4134_v60, %v5410_v16  ;;  %v5417_v61 = vand.u32 4294901760, %v4162_v21  ;;  %v5421_v8 = vand.u32 4294901760, %v4151_v20  ;;  %v4202_v16 = vld [vmem:[%s5402_s2 + $0xe0] sm:$0xff] }
  0x18   :  { %v233_v3 = vsub.f32 %v4144_v1, %v5411_v51  ;;  %3330 = vmatprep.subr.bf16.mxu0 %v4174_v52  ;;  %v5416_v27 = vand.u32 4294901760, %v4179_v54  ;;  %v5420_v40 = vand.u32 4294901760, %v4167_v31  ;;  %v4197_v11 = vsub.f32 %v3991_v36, %v101_v49  ;;  %v4207_v51 = vld [vmem:[%s5402_s2 + $0xe8] sm:$0xff] }
  0x19   :  { %v4209_v55 = vpack.c.bf16 %v346_v26, %v339_v24  ;;  %v227_v53 = vand.u32 4294901760, %v226_v39  ;;  %v352_v43 = vsub.f32 %v4162_v21, %v5417_v61  ;;  %v4217_v36 = vsub.f32 %v4013_v45, %v104_v56  ;;  %v4232_v39 = vld [vmem:[%s5402_s2 + $0x60] sm:$0xff]  ;;  %v4241_v61 = vld [vmem:[%s5402_s2 + $0x68] sm:$0xff] }
  0x1a   :  { %v234_v49 = vand.u32 4294901760, %v233_v3  ;;  %v359_v42 = vsub.f32 %v4179_v54, %v5416_v27  ;;  %v4226_v24 = vpack.c.bf16 %v5420_v40, %v5421_v8  ;;  %v5423_v26 = vand.u32 4294901760, %v4197_v11 }
  0x1b   :  { %5524 = vst [vmem:[#allocation6_spill] sm:$0xff] %v4209_v55  ;;  %3350 = vmatprep.subr.bf16.mxu1 %v4209_v55  ;;  %v353_v45 = vand.u32 4294901760, %v352_v43  ;;  %v5422_v56 = vand.u32 4294901760, %v4217_v36  ;;  %v5425_v3 = vand.u32 4294901760, %v4202_v16  ;;  %v5424_v27 = vand.u32 4294901760, %v4207_v51 }
  0x1c   :  { %v4243_v37 = vpack.c.bf16 %v234_v49, %v227_v53  ;;  %v360_v33 = vand.u32 4294901760, %v359_v42  ;;  %3332 = vmatpush3.bf16.msra.mxu0 %v4226_v24  ;;  %v240_v43 = vsub.f32 %v4197_v11, %v5423_v26  ;;  %v4252_v40 = vsub.f32 %v4043_v58, %v155_v9  ;;  %v4272_v58 = vld [vmem:[%s5402_s2 + $0xf0] sm:$0xff]  ;;  %v4277_v9 = vld [vmem:[%s5402_s2 + $0xf8] sm:$0xff] }
  0x1d   :  { %v247_v8 = vsub.f32 %v4217_v36, %v5422_v56  ;;  %v4261_v42 = vpack.c.bf16 %v5424_v27, %v5425_v3  ;;  %v4266_v53 = vsub.f32 %v4053_v63, %v158_v12  ;;  %v5429_v49 = vand.u32 4294901760, %v4232_v39 }
  0x1e   :  { %5525 = vst [vmem:[#allocation7_spill] sm:$0xff] %v4243_v37  ;;  %3352 = vmatpush3.bf16.msra.mxu1 %v4243_v37  ;;  %v4280_v56 = vpack.c.bf16 %v360_v33, %v353_v45  ;;  %v241_v26 = vand.u32 4294901760, %v240_v43  ;;  %v5427_v63 = vand.u32 4294901760, %v4252_v40  ;;  %v5428_v12 = vand.u32 4294901760, %v4241_v61 }
  0x1f   :  { %v248_v27 = vand.u32 4294901760, %v247_v8  ;;  %3334 = vmatprep.subr.bf16.mxu0 %v4261_v42  ;;  %v5431_v3 = vand.u32 4294901760, %v4266_v53  ;;  %v4289_v10 = vsub.f32 %v4070_v4, %v107_v41  ;;  %v4294_v33 = vsub.f32 %v4075_v5, %v110_v46  ;;  %v4311_v5 = vld [vmem:[%s5402_s2 + $0x70] sm:$0xff] }
  0x20   :  { %5526 = vst [vmem:[#allocation8_spill] sm:$0xff] %v4280_v56  ;;  %3354 = vmatprep.subr.bf16.mxu1 %v4280_v56  ;;  %v366_v8 = vsub.f32 %v4252_v40, %v5427_v63  ;;  %v4304_v45 = vpack.c.bf16 %v5428_v12, %v5429_v49  ;;  %v5435_v4 = vand.u32 4294901760, %v4272_v58  ;;  %v5434_v41 = vand.u32 4294901760, %v4277_v9  ;;  %v4323_v49 = vld [vmem:[%s5402_s2 + $0x78] sm:$0xff] }
  0x21   :  { %v4313_v46 = vpack.c.bf16 %v248_v27, %v241_v26  ;;  %v373_v43 = vsub.f32 %v4266_v53, %v5431_v3  ;;  %v5530_v26 = vand.u32 4294901760, %v4107_v14  ;;  %v5531_v12 = vand.u32 4294901760, %v4112_v19 }
  0x22   :  { %5527 = vst [vmem:[#allocation9_spill] sm:$0xff] %v4304_v45  ;;  %v367_v7 = vand.u32 4294901760, %v366_v8  ;;  %3336 = vmatpush3.bf16.msra.mxu0 %v4304_v45  ;;  %v4330_v27 = vpack.c.bf16 %v5434_v41, %v5435_v4  ;;  %v5532_v56 = vand.u32 4294901760, %v4289_v10  ;;  %v5533_v41 = vand.u32 4294901760, %v4294_v33 }
  0x23   :  { %5528 = vst [vmem:[#allocation10_spill] sm:$0xff] %v4313_v46  ;;  %v4335_v3 = vsub.f32 %v4107_v14, %v5530_v26  ;;  %v4340_v63 = vsub.f32 %v4112_v19, %v5531_v12  ;;  %3356 = vmatpush3.bf16.msra.mxu1 %v4313_v46  ;;  %v374_v8 = vand.u32 4294901760, %v373_v43  ;;  %v5534_v43 = vand.u32 4294901760, %v4151_v20 }
  0x24   :  { %5529 = vst [vmem:[#allocation11_spill] sm:$0xff] %v4330_v27  ;;  %v254_v37 = vsub.f32 %v4289_v10, %v5532_v56  ;;  %v261_v4 = vsub.f32 %v4294_v33, %v5533_v41  ;;  %3338 = vmatprep.subr.bf16.mxu0 %v4330_v27  ;;  %v15_v56 = vld [vmem:[%s5403_s0 + $0x8] sm:$0xff]  ;;  %v5536_v30 = vand.u32 4294901760, %v4167_v31  ;;  %v5539_v50 = vand.u32 4294901760, %v4311_v5 }
  0x25   :  { %v4357_v26 = vsub.f32 %v4151_v20, %v5534_v43  ;;  %v4362_v41 = vpack.c.bf16 %v374_v8, %v367_v7  ;;  %v5537_v12 = vand.u32 4294901760, %v4335_v3  ;;  %v5538_v20 = vand.u32 4294901760, %v4340_v63 }
  0x26   :  { %v255_v55 = vand.u32 4294901760, %v254_v37  ;;  %v262_v46 = vand.u32 4294901760, %v261_v4  ;;  %v4367_v14 = vsub.f32 %v4167_v31, %v5536_v30  ;;  %v5540_v7 = vand.u32 4294901760, %v4323_v49  ;;  %v14_v4 = vld [vmem:[%s5403_s0] sm:$0xff] }
  0x27   :  { %5535 = vst [vmem:[#allocation12_spill] sm:$0xff] %v4362_v41  ;;  %v380_v19 = vsub.f32 %v4335_v3, %v5537_v12  ;;  %v387_v43 = vsub.f32 %v4340_v63, %v5538_v20  ;;  %v5441_v37 = vand.u32 4294901760, %v4357_v26  ;;  %3358 = vmatprep.subr.bf16.mxu1 %v4362_v41  ;;  %v4389_v12 = vmax.f32 %v15_v56, 1e-06 }
  0x28   :  { %v4379_v8 = vpack.c.bf16 %v5540_v7, %v5539_v50  ;;  %v4383_v30 = vpack.c.bf16 %v262_v46, %v255_v55  ;;  %v5544_v20 = vand.u32 4294901760, %v4202_v16  ;;  %v5545_v46 = vand.u32 4294901760, %v4207_v51 }
  0x29   :  { %5543 = vst [vmem:[#allocation15_spill] sm:$0xff] %v4389_v12  ;;  %v381_v50 = vand.u32 4294901760, %v380_v19  ;;  %v388_v7 = vand.u32 4294901760, %v387_v43  ;;  %v268_v55 = vsub.f32 %v4357_v26, %v5441_v37  ;;  %v5546_v56 = vand.u32 4294901760, %v4367_v14 }
  0x2a   :  { %5541 = vst [vmem:[#allocation13_spill] sm:$0xff] %v4379_v8  ;;  %5542 = vst [vmem:[#allocation14_spill] sm:$0xff] %v4383_v30  ;;  %v4394_v6 = vsub.f32 %v4202_v16, %v5544_v20  ;;  %3340 = vmatpush3.bf16.msra.mxu0 %v4379_v8  ;;  %v4403_v31 = vsub.f32 %v4207_v51, %v5545_v46  ;;  %3360 = vmatpush3.bf16.msra.mxu1 %v4383_v30  ;;  %v4410_v19 = vand.u32 4294901760, %v4389_v12 }
  0x2b   :  { %v275_v16 = vsub.f32 %v4367_v14, %v5546_v56  ;;  %v4415_v20 = vpack.c.bf16 %v3972_v29, %v3957_v25  ;;  %v4417_v37 = vpack.c.bf16 %v388_v7, %v381_v50  ;;  %v269_v41 = vand.u32 4294901760, %v268_v55 }
  0x2c   :  { %5547 = vst [vmem:[#allocation16_spill] sm:$0xff] %v4410_v19  ;;  %v5447_v43 = vand.u32 4294901760, %v4394_v6  ;;  %v5450_v51 = vand.u32 4294901760, %v4403_v31  ;;  %v4420_v46 = vmax.f32 %v14_v4, 1e-06  ;;  %v4424_v56 = vsub.f32 %v4389_v12, %v4410_v19  ;;  %419 = vmatprep.mubr.f32.mxu1 %v4410_v19 }
  0x2d   :  { %5548 = vst [vmem:[#allocation17_spill] sm:$0xff] %v4415_v20  ;;  %5549 = vst [vmem:[#allocation18_spill] sm:$0xff] %v4417_v37  ;;  %v276_v30 = vand.u32 4294901760, %v275_v16  ;;  %3374 = vmatprep.subr.bf16.mxu0 %v4415_v20  ;;  %v5552_v8 = vand.u32 4294901760, %v4232_v39  ;;  %3362 = vmatprep.subr.bf16.mxu1 %v4417_v37  ;;  %v5553_v55 = vand.u32 4294901760, %v4241_v61  ;;  %v5557_v27 = vand.u32 4294901760, %v4272_v58 }
  0x2e   :  { %5550 = vst [vmem:[#allocation19_spill] sm:$0xff] %v4420_v46  ;;  %5551 = vst [vmem:[#allocation20_spill] sm:$0xff] %v4424_v56  ;;  %v394_v0 = vsub.f32 %v4394_v6, %v5447_v43  ;;  %v401_v4 = vsub.f32 %v4403_v31, %v5450_v51  ;;  %v4441_v7 = vand.u32 4294901760, %v4420_v46  ;;  %v5563_v19 = vand.u32 4294901760, %v4311_v5 }
  0x2f   :  { %v4433_v50 = vsub.f32 %v4232_v39, %v5552_v8  ;;  %v4446_v16 = vsub.f32 %v4241_v61, %v5553_v55  ;;  %v4448_v43 = vpack.c.bf16 %v276_v30, %v269_v41  ;;  %v4451_v39 = vand.u32 4294901760, %v4424_v56 }
  0x30   :  { %v395_v8 = vand.u32 4294901760, %v394_v0  ;;  %v402_v37 = vand.u32 4294901760, %v401_v4  ;;  %v4456_v51 = vsub.f32 %v4420_v46, %v4441_v7  ;;  %v4462_v61 = vsub.f32 %v4272_v58, %v5557_v27 }
  0x31   :  { %5554 = vst [vmem:[#allocation21_spill] sm:$0xff] %v4448_v43  ;;  %5555 = vst [vmem:[#allocation22_spill] sm:$0xff] %v4451_v39  ;;  %v5458_v20 = vand.u32 4294901760, %v4433_v50  ;;  %3364 = vmatpush3.bf16.msra.mxu1 %v4448_v43  ;;  %v181_v41 = vsub.f32 %v4424_v56, %v4451_v39  ;;  %v5558_v30 = vand.u32 4294901760, %v4277_v9  ;;  %v5561_v58 = vand.u32 4294901760, %v4446_v16 }
  0x32   :  { %5556 = vst [vmem:[#allocation23_spill] sm:$0xff] %v4456_v51  ;;  %v4475_v55 = vpack.c.bf16 %v402_v37, %v395_v8  ;;  %v4478_v12 = vand.u32 4294901760, %v4456_v51  ;;  %v5461_v43 = vand.u32 4294901760, %v4462_v61 }
  0x33   :  { %v282_v0 = vsub.f32 %v4433_v50, %v5458_v20  ;;  %v4473_v4 = vsub.f32 %v4277_v9, %v5558_v30  ;;  %v289_v27 = vsub.f32 %v4446_v16, %v5561_v58  ;;  %v4484_v46 = vand.u32 4294901760, %v181_v41 }
  0x34   :  { %5559 = vst [vmem:[#allocation24_spill] sm:$0xff] %v4475_v55  ;;  %5560 = vst [vmem:[#allocation25_spill] sm:$0xff] %v4478_v12  ;;  %v4490_v9 = vsub.f32 %v4311_v5, %v5563_v19  ;;  %3366 = vmatprep.subr.bf16.mxu1 %v4475_v55  ;;  %v187_v37 = vsub.f32 %v4456_v51, %v4478_v12  ;;  %v408_v30 = vsub.f32 %v4462_v61, %v5461_v43 }
  0x35   :  { %5562 = vst [vmem:[#allocation26_spill] sm:$0xff] %v4484_v46  ;;  %v283_v45 = vand.u32 4294901760, %v282_v0  ;;  %v5466_v20 = vand.u32 4294901760, %v4473_v4  ;;  %v290_v8 = vand.u32 4294901760, %v289_v27  ;;  %v5564_v41 = vand.u32 4294901760, %v4323_v49  ;;  %183 = vmatprep.mubr.f32.mxu0 %v4484_v46 }
  0x36   :  { %v4506_v5 = vpack.c.bf16 %v3986_v35, %v3984_v34  ;;  %v4513_v58 = vpack.c.bf16 %v4024_v48, %v4008_v44  ;;  %v5468_v27 = vand.u32 4294901760, %v4490_v9  ;;  %v4516_v43 = vand.u32 4294901760, %v187_v37 }
  0x37   :  { %v4501_v0 = vsub.f32 %v4323_v49, %v5564_v41  ;;  %v415_v19 = vsub.f32 %v4473_v4, %v5466_v20  ;;  %v4518_v49 = vpack.c.bf16 %v290_v8, %v283_v45  ;;  %v409_v41 = vand.u32 4294901760, %v408_v30 }
  0x38   :  { %5565 = vst [vmem:[#allocation27_spill] sm:$0xff] %v4506_v5  ;;  %5566 = vst [vmem:[#allocation28_spill] sm:$0xff] %v4513_v58  ;;  %v296_v12 = vsub.f32 %v4490_v9, %v5468_v27  ;;  %189 = vmatmul.mubr.f32.vlgmr.msra.gmra.mrb[0].mxu0 %v4516_v43  ;;  %v4534_v8 = vpack.c.bf16 %v4048_v62, %v4038_v57 }
  0x39   :  { %5567 = vst [vmem:[#allocation29_spill] sm:$0xff] %v4516_v43  ;;  %5568 = vst [vmem:[#allocation30_spill] sm:$0xff] %v4518_v49  ;;  %v5467_v46 = vand.u32 4294901760, %v4501_v0  ;;  %v416_v55 = vand.u32 4294901760, %v415_v19  ;;  %3368 = vmatpush3.bf16.msra.mxu1 %v4518_v49  ;;  %3376 = vmatpush3.bf16.msra.mxu0 %v4506_v5  ;;  %v4540_v19 = vpack.c.bf16 %v4100_v17, %v4091_v13  ;;  %v5575_v49 = vand.u32 4294901760, %v4024_v48 }
  0x3a   :  { %v297_v37 = vand.u32 4294901760, %v296_v12  ;;  %556 = vmatprep.mubr.f32.mxu0 %v4424_v56  ;;  %3378 = vmatprep.subr.bf16.mxu0 %v4513_v58  ;;  %v4549_v12 = vpack.c.bf16 %v4179_v54, %v4162_v21  ;;  %v5573_v56 = vand.u32 4294901760, %v3986_v35  ;;  %v5574_v58 = vand.u32 4294901760, %v4008_v44 }
  0x3b   :  { %v303_v20 = vsub.f32 %v4501_v0, %v5467_v46  ;;  %v4530_v45 = vpack.c.bf16 %v416_v55, %v409_v41  ;;  %v4545_v55 = vpack.c.bf16 %v4144_v1, %v4134_v60  ;;  %v5570_v41 = vand.u32 4294901760, %v3957_v25 }
  0x3c   :  { %v5571_v46 = vand.u32 4294901760, %v3972_v29  ;;  %v4569_v5 = vpack.c.bf16 %v5575_v49, %v5574_v58  ;;  %v5576_v25 = vand.u32 4294901760, %v4038_v57  ;;  %v5577_v29 = vand.u32 4294901760, %v4048_v62 }
  0x3d   :  { %5569 = vst [vmem:[#allocation31_spill] sm:$0xff] %v4530_v45  ;;  %v304_v30 = vand.u32 4294901760, %v303_v20  ;;  %3370 = vmatprep.subr.bf16.mxu1 %v4530_v45  ;;  %v5572_v20 = vand.u32 4294901760, %v3984_v34  ;;  %v5578_v34 = vand.u32 4294901760, %v4091_v13  ;;  %v5579_v35 = vand.u32 4294901760, %v4100_v17  ;;  %3380 = vmatpush3.bf16.msra.mxu0 %v4534_v8 }
  0x3e   :  { %v4555_v27 = vpack.c.bf16 %v5571_v46, %v5570_v41  ;;  %v4575_v46 = vpack.c.bf16 %v5577_v29, %v5576_v25  ;;  %v5580_v44 = vand.u32 4294901760, %v4134_v60  ;;  %v5581_v48 = vand.u32 4294901760, %v4144_v1  ;;  %3382 = vmatprep.subr.bf16.mxu0 %v4540_v19 }
  0x3f   :  { %v4561_v43 = vpack.c.bf16 %v5573_v56, %v5572_v20  ;;  %v4563_v45 = vpack.c.bf16 %v304_v30, %v297_v37  ;;  %v4581_v56 = vpack.c.bf16 %v5579_v35, %v5578_v34  ;;  %v5582_v57 = vand.u32 4294901760, %v4162_v21 }
  0x40   :  { %v4588_v58 = vpack.c.bf16 %v5581_v48, %v5580_v44  ;;  %v5583_v62 = vand.u32 4294901760, %v4179_v54  ;;  %v5584_v13 = vand.u32 4294901760, %v4197_v11  ;;  %v5585_v17 = vand.u32 4294901760, %v4217_v36 }
  0x41   :  { %v5586_v30 = vand.u32 4294901760, %v4252_v40  ;;  %v5587_v60 = vand.u32 4294901760, %v4266_v53  ;;  %3372 = vmatpush3.bf16.msra.mxu1 %v4563_v45  ;;  %v5588_v54 = vand.u32 4294901760, %v4289_v10  ;;  %v5589_v1 = vand.u32 4294901760, %v4294_v33  ;;  %3384 = vmatpush3.bf16.msra.mxu0 %v4545_v55 }
  0x42   :  { %v4594_v49 = vpack.c.bf16 %v5583_v62, %v5582_v57  ;;  %v4600_v37 = vpack.c.bf16 %v5585_v17, %v5584_v13  ;;  %v5590_v20 = vand.u32 4294901760, %v4335_v3  ;;  %v5591_v25 = vand.u32 4294901760, %v4340_v63  ;;  %3406 = vmatprep.subr.bf16.mxu1 %v3934_v15  ;;  %3386 = vmatprep.subr.bf16.mxu0 %v4549_v12  ;;  %v5598_v13 = vld [vmem:[#allocation25_spill] sm:$0xff]  ;;  %v5599_v17 = vld [vmem:[#allocation15_spill] sm:$0xff] }
  0x43   :  { %v4606_v41 = vpack.c.bf16 %v5587_v60, %v5586_v30  ;;  %v4614_v21 = vpack.c.bf16 %v5589_v1, %v5588_v54  ;;  %v5592_v34 = vand.u32 4294901760, %v4357_v26  ;;  %v5593_v35 = vand.u32 4294901760, %v4367_v14 }
  0x44   :  { %v4620_v29 = vpack.c.bf16 %v5591_v25, %v5590_v20  ;;  %421 = vmatmul.mubr.f32.vlgmr.msra.gmra.mrb[0].mxu1 %v4441_v7  ;;  %v4633_v48 = vpack.c.bf16 %v4217_v36, %v4197_v11  ;;  %v4639_v57 = vpack.c.bf16 %v4266_v53, %v4252_v40  ;;  %v4646_v62 = vpack.c.bf16 %v4294_v33, %v4289_v10  ;;  %v5595_v33 = vld [vmem:[#allocation9_spill] sm:$0xff] }
  0x45   :  { %v4626_v44 = vpack.c.bf16 %v5593_v35, %v5592_v34  ;;  %3408 = vmatpush3.bf16.msra.mxu1 %v3952_v22  ;;  %663 = vmatprep.mubr.f32.mxu1 %v4451_v39  ;;  %v4652_v11 = vpack.c.bf16 %v4340_v63, %v4335_v3  ;;  %v4658_v40 = vpack.c.bf16 %v4367_v14, %v4357_v26  ;;  %v5594_v63 = vld [vmem:[#allocation16_spill] sm:$0xff]  ;;  %v5596_v14 = vld [vmem:[#allocation11_spill] sm:$0xff]  ;;  %v5597_v26 = vld [vmem:[#allocation13_spill] sm:$0xff]  ;;  %v5600_v1 = vand.u32 4294901760, %v4394_v6 }
  0x46   :  { %3410 = vmatprep.subr.bf16.mxu1 %v3954_v23  ;;  %3388 = vmatpush3.bf16.msra.mxu0 %v4633_v48  ;;  %v4664_v10 = vpack.c.bf16 %v4403_v31, %v4394_v6  ;;  %v4670_v36 = vpack.c.bf16 %v4446_v16, %v4433_v50  ;;  %v4676_v3 = vpack.c.bf16 %v4473_v4, %v4462_v61  ;;  %v5601_v20 = vand.u32 4294901760, %v4403_v31 }
  0x47   :  { %3390 = vmatprep.subr.bf16.mxu0 %v4639_v57  ;;  %v4682_v53 = vpack.c.bf16 %v4501_v0, %v4490_v9  ;;  %v945_v30 = vmul.f32 %v5599_v17, %v5599_v17  ;;  %v5602_v34 = vand.u32 4294901760, %v4433_v50  ;;  %v5603_v35 = vand.u32 4294901760, %v4446_v16 }
  0x48   :  { %v4725_v25 = vpack.c.bf16 %v5601_v20, %v5600_v1  ;;  %v5604_v6 = vand.u32 4294901760, %v4462_v61  ;;  %v5605_v31 = vand.u32 4294901760, %v4473_v4  ;;  %v5606_v50 = vand.u32 4294901760, %v4490_v9  ;;  %v5608_v4 = vld [vmem:[#allocation2_spill] sm:$0xff]  ;;  %v5609_v9 = vld [vmem:[#allocation19_spill] sm:$0xff] }
  0x49   :  { %3412 = vmatpush3.bf16.msra.mxu1 %v3970_v28  ;;  %v4710_v60 = vand.u32 4294901760, %v945_v30  ;;  %v4733_v17 = vpack.c.bf16 %v5603_v35, %v5602_v34  ;;  %v5607_v16 = vand.u32 4294901760, %v4501_v0  ;;  %v944_v0 = vmul.f32 %v5609_v9, %v5609_v9  ;;  %v5610_v35 = vld [vmem:[#allocation3_spill] sm:$0xff] }
  0x4a   :  { %3414 = vmatprep.subr.bf16.mxu1 %v3981_v32  ;;  %3392 = vmatpush3.bf16.msra.mxu0 %v4646_v62  ;;  %v4742_v1 = vpack.c.bf16 %v5605_v31, %v5604_v6  ;;  %v5611_v6 = vld [vmem:[#allocation4_spill] sm:$0xff] }
  0x4b   :  { %3394 = vmatprep.subr.bf16.mxu0 %v4652_v11  ;;  %v4717_v54 = vsub.f32 %v945_v30, %v4710_v60  ;;  %v4750_v20 = vpack.c.bf16 %v5607_v16, %v5606_v50  ;;  %v4779_v31 = vand.u32 4294901760, %v944_v0  ;;  %v5612_v50 = vld [vmem:[#allocation5_spill] sm:$0xff]  ;;  %v5613_v16 = vld [vmem:[#allocation6_spill] sm:$0xff] }
  0x4d   :  { %3416 = vmatpush3.bf16.msra.mxu1 %v3999_v38  ;;  %v5475_v30 = vand.u32 4294901760, %v4717_v54 }
  0x4e   :  { %3418 = vmatprep.subr.bf16.mxu1 %v4022_v47  ;;  %3396 = vmatpush3.bf16.msra.mxu0 %v4658_v40 }
  0x4f   :  { %3398 = vmatprep.subr.bf16.mxu0 %v4664_v10  ;;  %v1045_v34 = vsub.f32 %v4717_v54, %v5475_v30  ;;  %v5623_v30 = vld [vmem:[#allocation27_spill] sm:$0xff] }
  0x51   :  { %3420 = vmatpush3.bf16.msra.mxu1 %v4064_v2  ;;  %v1046_v61 = vand.u32 4294901760, %v1045_v34  ;;  %v4786_v34 = vsub.f32 %v944_v0, %v4779_v31 }
  0x52   :  { %3422 = vmatprep.subr.bf16.mxu1 %v4120_v18  ;;  %3400 = vmatpush3.bf16.msra.mxu0 %v4670_v36 }
  0x53   :  { %3402 = vmatprep.subr.bf16.mxu0 %v4676_v3  ;;  %v5476_v9 = vand.u32 4294901760, %v4786_v34 }
  0x55   :  { %3424 = vmatpush3.bf16.msra.mxu1 %v4129_v59  ;;  %v1051_v0 = vsub.f32 %v4786_v34, %v5476_v9  ;;  %v5624_v9 = vld [vmem:[#allocation30_spill] sm:$0xff] }
  0x56   :  { %3426 = vmatprep.subr.bf16.mxu1 %v4174_v52  ;;  %3404 = vmatpush3.bf16.msra.mxu0 %v4682_v53 }
  0x57   :  { %3438 = vmatprep.subr.bf16.mxu0 %v4555_v27 }
  0x59   :  { %3428 = vmatpush3.bf16.msra.mxu1 %v4226_v24  ;;  %559 = vmatmul.mubr.f32.vlgmr.msra.gmra.mrb[2].mxu0 %v4456_v51 }
  0x5a   :  { %3430 = vmatprep.subr.bf16.mxu1 %v4261_v42  ;;  %3440 = vmatpush3.bf16.msra.mxu0 %v4561_v43 }
  0x5b   :  { %833 = vmatprep.mubr.f32.mxu0 %v5594_v63  ;;  %3442 = vmatprep.subr.bf16.mxu0 %v4569_v5 }
  0x5d   :  { %3432 = vmatpush3.bf16.msra.mxu1 %v5595_v33 }
  0x5e   :  { %3434 = vmatprep.subr.bf16.mxu1 %v5596_v14  ;;  %3444 = vmatpush3.bf16.msra.mxu0 %v4575_v46 }
  0x5f   :  { %3446 = vmatprep.subr.bf16.mxu0 %v4581_v56 }
  0x61   :  { %3436 = vmatpush3.bf16.msra.mxu1 %v5597_v26 }
  0x62   :  { %3470 = vmatprep.subr.bf16.mxu1 %v3934_v15  ;;  %3448 = vmatpush3.bf16.msra.mxu0 %v4588_v58 }
  0x63   :  { %3450 = vmatprep.subr.bf16.mxu0 %v4594_v49 }
  0x64   :  { %667 = vmatmul.mubr.f32.vlgmr.msra.gmra.mrb[2].mxu1 %v5598_v13  ;;  %v5626_v13 = vld [vmem:[#allocation31_spill] sm:$0xff] }
  0x65   :  { %3472 = vmatpush3.bf16.msra.mxu1 %v3952_v22  ;;  %937 = vmatprep.mubr.f32.mxu1 %v5594_v63 }
  0x66   :  { %3474 = vmatprep.subr.bf16.mxu1 %v3954_v23  ;;  %3452 = vmatpush3.bf16.msra.mxu0 %v4600_v37 }
  0x67   :  { %3454 = vmatprep.subr.bf16.mxu0 %v4606_v41 }
  0x69   :  { %3476 = vmatpush3.bf16.msra.mxu1 %v3970_v28 }
  0x6a   :  { %3478 = vmatprep.subr.bf16.mxu1 %v3981_v32  ;;  %3456 = vmatpush3.bf16.msra.mxu0 %v4614_v21 }
  0x6b   :  { %3458 = vmatprep.subr.bf16.mxu0 %v4620_v29 }
  0x6d   :  { %3480 = vmatpush3.bf16.msra.mxu1 %v3999_v38 }
  0x6e   :  { %3482 = vmatprep.subr.bf16.mxu1 %v4022_v47  ;;  %3460 = vmatpush3.bf16.msra.mxu0 %v4626_v44 }
  0x6f   :  { %3462 = vmatprep.subr.bf16.mxu0 %v4725_v25 }
  0x71   :  { %3484 = vmatpush3.bf16.msra.mxu1 %v4064_v2 }
  0x72   :  { %3486 = vmatprep.subr.bf16.mxu1 %v4120_v18  ;;  %3464 = vmatpush3.bf16.msra.mxu0 %v4733_v17 }
  0x73   :  { %3466 = vmatprep.subr.bf16.mxu0 %v4742_v1 }
  0x75   :  { %3488 = vmatpush3.bf16.msra.mxu1 %v4129_v59 }
  0x76   :  { %3490 = vmatprep.subr.bf16.mxu1 %v4174_v52  ;;  %3468 = vmatpush3.bf16.msra.mxu0 %v4750_v20 }
  0x77   :  { %3502 = vmatprep.subr.bf16.mxu0 %v3934_v15 }
  0x79   :  { %3492 = vmatpush3.bf16.msra.mxu1 %v4226_v24  ;;  %835 = vmatmul.mubr.f32.vlgmr.msra.gmra.mrb[4].mxu0 %v4441_v7 }
  0x7a   :  { %3494 = vmatprep.subr.bf16.mxu1 %v4261_v42  ;;  %3504 = vmatpush3.bf16.msra.mxu0 %v3952_v22 }
  0x7b   :  { %1047 = vmatprep.mubr.f32.mxu0 %v1046_v61  ;;  %3506 = vmatprep.subr.bf16.mxu0 %v3954_v23  ;;  %v5614_v61 = vld [vmem:[#allocation7_spill] sm:$0xff] }
  0x7d   :  { %3496 = vmatpush3.bf16.msra.mxu1 %v5595_v33 }
  0x7e   :  { %3498 = vmatprep.subr.bf16.mxu1 %v5596_v14  ;;  %3508 = vmatpush3.bf16.msra.mxu0 %v3970_v28 }
  0x7f   :  { %3510 = vmatprep.subr.bf16.mxu0 %v3981_v32 }
  0x81   :  { %3500 = vmatpush3.bf16.msra.mxu1 %v5597_v26 }
  0x82   :  { %3534 = vmatprep.subr.bf16.mxu1 %v5608_v4  ;;  %3512 = vmatpush3.bf16.msra.mxu0 %v3999_v38  ;;  %v5615_v4 = vld [vmem:[#allocation8_spill] sm:$0xff] }
  0x83   :  { %3514 = vmatprep.subr.bf16.mxu0 %v4022_v47 }
  0x84   :  { %939 = vmatmul.mubr.f32.vlgmr.msra.gmra.mrb[4].mxu1 %v4441_v7 }
  0x85   :  { %3536 = vmatpush3.bf16.msra.mxu1 %v5610_v35  ;;  %1283 = vmatprep.mubr.f32.mxu1 %v4710_v60  ;;  %v5616_v35 = vld [vmem:[#allocation10_spill] sm:$0xff] }
  0x86   :  { %3538 = vmatprep.subr.bf16.mxu1 %v5611_v6  ;;  %3516 = vmatpush3.bf16.msra.mxu0 %v4064_v2  ;;  %v5617_v6 = vld [vmem:[#allocation12_spill] sm:$0xff] }
  0x87   :  { %3518 = vmatprep.subr.bf16.mxu0 %v4120_v18 }
  0x89   :  { %3540 = vmatpush3.bf16.msra.mxu1 %v5612_v50  ;;  %v5618_v50 = vld [vmem:[#allocation14_spill] sm:$0xff] }
  0x8a   :  { %3542 = vmatprep.subr.bf16.mxu1 %v5613_v16  ;;  %3520 = vmatpush3.bf16.msra.mxu0 %v4129_v59  ;;  %v5619_v16 = vld [vmem:[#allocation18_spill] sm:$0xff] }
  0x8b   :  { %3522 = vmatprep.subr.bf16.mxu0 %v4174_v52 }
  0x8d   :  { %3544 = vmatpush3.bf16.msra.mxu1 %v5614_v61  ;;  %v1052_v61 = vand.u32 4294901760, %v1051_v0 }
  0x8e   :  { %3546 = vmatprep.subr.bf16.mxu1 %v5615_v4  ;;  %3524 = vmatpush3.bf16.msra.mxu0 %v4226_v24  ;;  %v5620_v4 = vld [vmem:[#allocation21_spill] sm:$0xff] }
  0x8f   :  { %3526 = vmatprep.subr.bf16.mxu0 %v4261_v42 }
  0x91   :  { %3548 = vmatpush3.bf16.msra.mxu1 %v5616_v35  ;;  %v5621_v35 = vld [vmem:[#allocation17_spill] sm:$0xff] }
  0x92   :  { %3550 = vmatprep.subr.bf16.mxu1 %v5617_v6  ;;  %3528 = vmatpush3.bf16.msra.mxu0 %v5595_v33  ;;  %v5622_v6 = vld [vmem:[#allocation24_spill] sm:$0xff] }
  0x93   :  { %3530 = vmatprep.subr.bf16.mxu0 %v5596_v14 }
  0x95   :  { %3552 = vmatpush3.bf16.msra.mxu1 %v5618_v50  ;;  %v5625_v50 = vld [vmem:[#allocation28_spill] sm:$0xff] }
  0x96   :  { %3554 = vmatprep.subr.bf16.mxu1 %v5619_v16  ;;  %3532 = vmatpush3.bf16.msra.mxu0 %v5597_v26 }
  0x97   :  { %3566 = vmatprep.subr.bf16.mxu0 %v5621_v35 }
  0x99   :  { %3556 = vmatpush3.bf16.msra.mxu1 %v5620_v4  ;;  %1053 = vmatmul.mubr.f32.vlgmr.msra.gmra.mrb[6].mxu0 %v1052_v61 }
  0x9a   :  { %3558 = vmatprep.subr.bf16.mxu1 %v5622_v6  ;;  %3568 = vmatpush3.bf16.msra.mxu0 %v5623_v30 }
  0x9b   :  { %1420 = vmatprep.mubr.f32.mxu0 %v4717_v54  ;;  %3570 = vmatprep.subr.bf16.mxu0 %v5625_v50 }
  0x9d   :  { %3560 = vmatpush3.bf16.msra.mxu1 %v5624_v9 }
  0x9e   :  { %3562 = vmatprep.subr.bf16.mxu1 %v5626_v13  ;;  %3572 = vmatpush3.bf16.msra.mxu0 %v4534_v8  ;;  %v5627_v13 = vand.u32 4294901760, %v4717_v54  ;;  %v35_v8 = vld [vmem:[%s5404_s1 + $0x88] sm:$0xff] }
  0x9f   :  { %3574 = vmatprep.subr.bf16.mxu0 %v4540_v19  ;;  %v19_v19 = vld [vmem:[%s5404_s1 + $0x8] sm:$0xff] }
  0xa1   :  { %3564 = vmatpush3.bf16.msra.mxu1 %v4563_v45  ;;  %v34_v45 = vld [vmem:[%s5404_s1 + $0x80] sm:$0xff] }
  0xa2   :  { %3598 = vmatprep.subr.bf16.mxu1 %v3934_v15  ;;  %3576 = vmatpush3.bf16.msra.mxu0 %v4545_v55  ;;  %v1860_v55 = vand.u32 4294901760, %v34_v45 }
  0xa3   :  { %3578 = vmatprep.subr.bf16.mxu0 %v4549_v12  ;;  %v1863_v12 = vand.u32 4294901760, %v35_v8 }
  0xa4   :  { %1285 = vmatmul.mubr.f32.vlgmr.msra.gmra.mrb[6].mxu1 %v4779_v31 }
  0xa5   :  { %3600 = vmatpush3.bf16.msra.mxu1 %v3952_v22  ;;  %1527 = vmatprep.mubr.f32.mxu1 %v5627_v13  ;;  %v4930_v35 = vpack.c.bf16 %v1863_v12, %v1860_v55 }
  0xa6   :  { %3602 = vmatprep.subr.bf16.mxu1 %v3954_v23  ;;  %3580 = vmatpush3.bf16.msra.mxu0 %v4633_v48 }
  0xa7   :  { %3582 = vmatprep.subr.bf16.mxu0 %v4639_v57  ;;  %v4866_v57 = vsub.f32 %v34_v45, %v1860_v55 }
  0xa9   :  { %3604 = vmatpush3.bf16.msra.mxu1 %v3970_v28 }
  0xaa   :  { %3606 = vmatprep.subr.bf16.mxu1 %v3981_v32  ;;  %3584 = vmatpush3.bf16.msra.mxu0 %v4646_v62  ;;  %v4868_v62 = vsub.f32 %v35_v8, %v1863_v12 }
  0xab   :  { %3586 = vmatprep.subr.bf16.mxu0 %v4652_v11  ;;  %v37_v11 = vld [vmem:[%s5404_s1 + $0x98] sm:$0xff] }
  0xad   :  { %3608 = vmatpush3.bf16.msra.mxu1 %v3999_v38 }
  0xae   :  { %3610 = vmatprep.subr.bf16.mxu1 %v4022_v47  ;;  %3588 = vmatpush3.bf16.msra.mxu0 %v4658_v40 }
  0xaf   :  { %3590 = vmatprep.subr.bf16.mxu0 %v4664_v10  ;;  %v1869_v10 = vand.u32 4294901760, %v37_v11 }
  0xb1   :  { %3612 = vmatpush3.bf16.msra.mxu1 %v4064_v2  ;;  %v4908_v9 = vsub.f32 %v37_v11, %v1869_v10 }
  0xb2   :  { %3614 = vmatprep.subr.bf16.mxu1 %v4120_v18  ;;  %3592 = vmatpush3.bf16.msra.mxu0 %v4670_v36  ;;  %v20_v36 = vld [vmem:[%s5404_s1 + $0x10] sm:$0xff] }
  0xb3   :  { %3594 = vmatprep.subr.bf16.mxu0 %v4676_v3  ;;  %v21_v3 = vld [vmem:[%s5404_s1 + $0x18] sm:$0xff]  ;;  %v1818_v54 = vand.u32 4294901760, %v20_v36 }
  0xb4   :  { %v1821_v30 = vand.u32 4294901760, %v21_v3 }
  0xb5   :  { %3616 = vmatpush3.bf16.msra.mxu1 %v4129_v59  ;;  %v4932_v6 = vsub.f32 %v20_v36, %v1818_v54 }
  0xb6   :  { %3618 = vmatprep.subr.bf16.mxu1 %v4174_v52  ;;  %3596 = vmatpush3.bf16.msra.mxu0 %v4682_v53  ;;  %v4934_v50 = vsub.f32 %v21_v3, %v1821_v30  ;;  %v4948_v12 = vpack.c.bf16 %v1821_v30, %v1818_v54 }
  0xb7   :  { %3630 = vmatprep.subr.bf16.mxu0 %v4555_v27  ;;  %v18_v27 = vld [vmem:[%s5404_s1] sm:$0xff]  ;;  %v5477_v3 = vand.u32 4294901760, %v4932_v6 }
  0xb8   :  { %v1812_v48 = vand.u32 4294901760, %v18_v27  ;;  %5629 = vst [vmem:[#allocation9_spill] sm:$0xff] %v4948_v12  ;;  %v5478_v54 = vand.u32 4294901760, %v4934_v50 }
  0xb9   :  { %3620 = vmatpush3.bf16.msra.mxu1 %v4226_v24  ;;  %1423 = vmatmul.mubr.f32.vlgmr.msra.gmra.mrb[8].mxu0 %v4786_v34 }
  0xba   :  { %3622 = vmatprep.subr.bf16.mxu1 %v4261_v42  ;;  %3632 = vmatpush3.bf16.msra.mxu0 %v4561_v43  ;;  %v1815_v43 = vand.u32 4294901760, %v19_v19  ;;  %v4876_v40 = vsub.f32 %v18_v27, %v1812_v48  ;;  %v40_v27 = vld [vmem:[%s5404_s1 + $0xb0] sm:$0xff] }
  0xbb   :  { %1697 = vmatprep.mubr.f32.mxu0 %v4710_v60  ;;  %3634 = vmatprep.subr.bf16.mxu0 %v4569_v5  ;;  %v36_v5 = vld [vmem:[%s5404_s1 + $0x90] sm:$0xff]  ;;  %v1878_v36 = vand.u32 4294901760, %v40_v27 }
  0xbc   :  { %v4938_v45 = vpack.c.bf16 %v1815_v43, %v1812_v48 }
  0xbd   :  { %3624 = vmatpush3.bf16.msra.mxu1 %v5595_v33 }
  0xbe   :  { %3626 = vmatprep.subr.bf16.mxu1 %v5596_v14  ;;  %3636 = vmatpush3.bf16.msra.mxu0 %v4575_v46  ;;  %v4878_v46 = vsub.f32 %v19_v19, %v1815_v43  ;;  %v5479_v19 = vand.u32 4294901760, %v4908_v9 }
  0xbf   :  { %3638 = vmatprep.subr.bf16.mxu0 %v4581_v56  ;;  %v5628_v56 = vand.u32 4294901760, %v4786_v34  ;;  %v38_v34 = vld [vmem:[%s5404_s1 + $0xa0] sm:$0xff] }
  0xc0   :  { %v5484_v53 = vand.u32 4294901760, %v4878_v46  ;;  %v1872_v16 = vand.u32 4294901760, %v38_v34 }
  0xc1   :  { %3628 = vmatpush3.bf16.msra.mxu1 %v5597_v26 }
  0xc2   :  { %3662 = vmatprep.subr.bf16.mxu1 %v3934_v15  ;;  %3640 = vmatpush3.bf16.msra.mxu0 %v4588_v58  ;;  %v1866_v15 = vand.u32 4294901760, %v36_v5  ;;  %v5488_v58 = vand.u32 4294901760, %v4866_v57  ;;  %v4953_v48 = vsub.f32 %v38_v34, %v1872_v16 }
  0xc3   :  { %3642 = vmatprep.subr.bf16.mxu0 %v4594_v49  ;;  %v5485_v49 = vand.u32 4294901760, %v4876_v40 }
  0xc4   :  { %1531 = vmatmul.mubr.f32.vlgmr.msra.gmra.mrb[8].mxu1 %v5628_v56  ;;  %v2039_v0 = vsub.f32 %v4866_v57, %v5488_v58  ;;  %v4946_v55 = vpack.c.bf16 %v1869_v10, %v1866_v15 }
  0xc5   :  { %3664 = vmatpush3.bf16.msra.mxu1 %v3952_v22  ;;  %1801 = vmatprep.mubr.f32.mxu1 %v4710_v60  ;;  %v5487_v22 = vand.u32 4294901760, %v4868_v62  ;;  %v4906_v60 = vsub.f32 %v36_v5, %v1866_v15  ;;  %v1927_v4 = vsub.f32 %v4876_v40, %v5485_v49  ;;  %v25_v15 = vld [vmem:[%s5404_s1 + $0x38] sm:$0xff] }
  0xc6   :  { %3666 = vmatprep.subr.bf16.mxu1 %v3954_v23  ;;  %3644 = vmatpush3.bf16.msra.mxu0 %v4600_v37  ;;  %v39_v23 = vld [vmem:[%s5404_s1 + $0xa8] sm:$0xff]  ;;  %v22_v37 = vld [vmem:[%s5404_s1 + $0x20] sm:$0xff] }
  0xc7   :  { %3646 = vmatprep.subr.bf16.mxu0 %v4606_v41  ;;  %v23_v41 = vld [vmem:[%s5404_s1 + $0x28] sm:$0xff]  ;;  %v1875_v61 = vand.u32 4294901760, %v39_v23  ;;  %v1824_v13 = vand.u32 4294901760, %v22_v37  ;;  %v1928_v11 = vand.u32 4294901760, %v1927_v4  ;;  %v42_v4 = vld [vmem:[%s5404_s1 + $0xc0] sm:$0xff] }
  0xc8   :  { %v1827_v8 = vand.u32 4294901760, %v23_v41 }
  0xc9   :  { %3668 = vmatpush3.bf16.msra.mxu1 %v3970_v28  ;;  %v2046_v28 = vsub.f32 %v4868_v62, %v5487_v22  ;;  %v4955_v43 = vsub.f32 %v39_v23, %v1875_v61  ;;  %v4964_v10 = vsub.f32 %v22_v37, %v1824_v13  ;;  %v4979_v37 = vpack.c.bf16 %v1875_v61, %v1872_v16 }
  0xca   :  { %3670 = vmatprep.subr.bf16.mxu1 %v3981_v32  ;;  %v1934_v32 = vsub.f32 %v4878_v46, %v5484_v53  ;;  %3648 = vmatpush3.bf16.msra.mxu0 %v4614_v21  ;;  %v5480_v21 = vand.u32 4294901760, %v4906_v60  ;;  %v4970_v30 = vsub.f32 %v23_v41, %v1827_v8  ;;  %v4996_v61 = vsub.f32 %v40_v27, %v1878_v36  ;;  %v26_v27 = vld [vmem:[%s5404_s1 + $0x40] sm:$0xff] }
  0xcb   :  { %3650 = vmatprep.subr.bf16.mxu0 %v4620_v29  ;;  %v2047_v5 = vand.u32 4294901760, %v2046_v28  ;;  %v41_v29 = vld [vmem:[%s5404_s1 + $0xb8] sm:$0xff]  ;;  %5630 = vst [vmem:[#allocation11_spill] sm:$0xff] %v4979_v37  ;;  %v1833_v28 = vand.u32 4294901760, %v25_v15  ;;  %v5482_v16 = vand.u32 4294901760, %v4955_v43 }
  0xcc   :  { %v1935_v56 = vand.u32 4294901760, %v1934_v32  ;;  %v1881_v34 = vand.u32 4294901760, %v41_v29  ;;  %v2053_v23 = vsub.f32 %v4906_v60, %v5480_v21  ;;  %v43_v32 = vld [vmem:[%s5404_s1 + $0xc8] sm:$0xff] }
  0xcd   :  { %3672 = vmatpush3.bf16.msra.mxu1 %v3999_v38  ;;  %v2040_v38 = vand.u32 4294901760, %v2039_v0 }
  0xce   :  { %3674 = vmatprep.subr.bf16.mxu1 %v4022_v47  ;;  %v24_v47 = vld [vmem:[%s5404_s1 + $0x30] sm:$0xff]  ;;  %3652 = vmatpush3.bf16.msra.mxu0 %v4626_v44  ;;  %v2060_v44 = vsub.f32 %v4908_v9, %v5479_v19  ;;  %v4985_v41 = vpack.c.bf16 %v1935_v56, %v1928_v11  ;;  %v2054_v11 = vand.u32 4294901760, %v2053_v23  ;;  %v5486_v56 = vand.u32 4294901760, %v4970_v30 }
  0xcf   :  { %3654 = vmatprep.subr.bf16.mxu0 %v4725_v25  ;;  %v4981_v0 = vpack.c.bf16 %v2047_v5, %v2040_v38  ;;  %v4983_v25 = vpack.c.bf16 %v1827_v8, %v1824_v13  ;;  %v1941_v13 = vsub.f32 %v4932_v6, %v5477_v3  ;;  %v1948_v8 = vsub.f32 %v4934_v50, %v5478_v54 }
  0xd0   :  { %v5481_v38 = vand.u32 4294901760, %v4964_v10  ;;  %v5007_v5 = vsub.f32 %v41_v29, %v1881_v34  ;;  %v5014_v3 = vpack.c.bf16 %v1881_v34, %v1878_v36  ;;  %v1884_v19 = vand.u32 4294901760, %v42_v4 }
  0xd1   :  { %3676 = vmatpush3.bf16.msra.mxu1 %v4064_v2  ;;  %v1830_v2 = vand.u32 4294901760, %v24_v47  ;;  %5631 = vst [vmem:[#allocation13_spill] sm:$0xff] %v4983_v25  ;;  %v2074_v23 = vsub.f32 %v4955_v43, %v5482_v16  ;;  %v1942_v36 = vand.u32 4294901760, %v1941_v13  ;;  %v1949_v34 = vand.u32 4294901760, %v1948_v8 }
  0xd2   :  { %3678 = vmatprep.subr.bf16.mxu1 %v4120_v18  ;;  %v5483_v18 = vand.u32 4294901760, %v4953_v48  ;;  %3656 = vmatpush3.bf16.msra.mxu0 %v4733_v17  ;;  %v2061_v17 = vand.u32 4294901760, %v2060_v44  ;;  %5632 = vst [vmem:[#allocation15_spill] sm:$0xff] %v5014_v3  ;;  %v44_v44 = vld [vmem:[%s5404_s1 + $0xd0] sm:$0xff]  ;;  %v5489_v13 = vand.u32 4294901760, %v4996_v61  ;;  %v5490_v8 = vand.u32 4294901760, %v5007_v5 }
  0xd3   :  { %3658 = vmatprep.subr.bf16.mxu0 %v4742_v1  ;;  %v5016_v54 = vpack.c.bf16 %v1833_v28, %v1830_v2  ;;  %v5018_v21 = vsub.f32 %v24_v47, %v1830_v2  ;;  %v5020_v1 = vsub.f32 %v25_v15, %v1833_v28  ;;  %v1836_v47 = vand.u32 4294901760, %v26_v27  ;;  %v45_v2 = vld [vmem:[%s5404_s1 + $0xd8] sm:$0xff] }
  0xd4   :  { %v2067_v29 = vsub.f32 %v4953_v48, %v5483_v18  ;;  %v1955_v15 = vsub.f32 %v4964_v10, %v5481_v38  ;;  %v1962_v28 = vsub.f32 %v4970_v30, %v5486_v56  ;;  %v5053_v16 = vsub.f32 %v42_v4, %v1884_v19  ;;  %v28_v56 = vld [vmem:[%s5404_s1 + $0x50] sm:$0xff] }
  0xd5   :  { %3680 = vmatpush3.bf16.msra.mxu1 %v4129_v59  ;;  %5633 = vst [vmem:[#allocation2_spill] sm:$0xff] %v5016_v54  ;;  %v1887_v59 = vand.u32 4294901760, %v43_v32  ;;  %v1890_v53 = vand.u32 4294901760, %v44_v44  ;;  %v1893_v49 = vand.u32 4294901760, %v45_v2  ;;  %v5067_v4 = vsub.f32 %v26_v27, %v1836_v47 }
  0xd6   :  { %3682 = vmatprep.subr.bf16.mxu1 %v4174_v52  ;;  %v27_v52 = vld [vmem:[%s5404_s1 + $0x48] sm:$0xff]  ;;  %3660 = vmatpush3.bf16.msra.mxu0 %v4750_v20  ;;  %v5043_v20 = vpack.c.bf16 %v2061_v17, %v2054_v11  ;;  %v2068_v11 = vand.u32 4294901760, %v2067_v29  ;;  %v2075_v17 = vand.u32 4294901760, %v2074_v23  ;;  %v5636_v29 = vld [vmem:[#allocation26_spill] sm:$0xff]  ;;  %v1963_v23 = vand.u32 4294901760, %v1962_v28 }
  0xd7   :  { %3694 = vmatprep.subr.bf16.mxu0 %v4930_v35  ;;  %v5051_v38 = vpack.c.bf16 %v1887_v59, %v1884_v19  ;;  %v5055_v18 = vsub.f32 %v43_v32, %v1887_v59  ;;  %v5065_v19 = vpack.c.bf16 %v1949_v34, %v1942_v36  ;;  %5635 = vst [vmem:[#allocation3_spill] sm:$0xff] %v5067_v4  ;;  %v1956_v32 = vand.u32 4294901760, %v1955_v15  ;;  %v46_v34 = vld [vmem:[%s5404_s1 + $0xe0] sm:$0xff] }
  0xd8   :  { %v2081_v22 = vsub.f32 %v4996_v61, %v5489_v13  ;;  %v2088_v36 = vsub.f32 %v5007_v5, %v5490_v8  ;;  %v1842_v28 = vand.u32 4294901760, %v28_v56  ;;  %v5088_v58 = vpack.c.bf16 %v2075_v17, %v2068_v11  ;;  %v47_v8 = vld [vmem:[%s5404_s1 + $0xe8] sm:$0xff] }
  0xd9   :  { %3684 = vmatpush3.bf16.msra.mxu1 %v4226_v24  ;;  %5634 = vst [vmem:[#allocation19_spill] sm:$0xff] %v5051_v38  ;;  %v1839_v24 = vand.u32 4294901760, %v27_v52  ;;  %1699 = vmatmul.mubr.f32.vlgmr.msra.gmra.mrb[10].mxu0 %v4779_v31  ;;  %v5090_v13 = vpack.c.bf16 %v1893_v49, %v1890_v53  ;;  %v1896_v11 = vand.u32 4294901760, %v46_v34  ;;  %v5107_v17 = vpack.c.bf16 %v1963_v23, %v1956_v32 }
  0xda   :  { %3686 = vmatprep.subr.bf16.mxu1 %v4261_v42  ;;  %v29_v42 = vld [vmem:[%s5404_s1 + $0x58] sm:$0xff]  ;;  %3696 = vmatpush3.bf16.msra.mxu0 %v4938_v45  ;;  %v2082_v27 = vand.u32 4294901760, %v2081_v22  ;;  %v2089_v51 = vand.u32 4294901760, %v2088_v36  ;;  %v5641_v59 = vand.u32 4294901760, %v5020_v1  ;;  %v5127_v22 = vld [vmem:[%s5404_s1 + $0x68] sm:$0xff]  ;;  %v5642_v32 = vand.u32 4294901760, %v5053_v16 }
  0xdb   :  { %1912 = vmatprep.mubr.f32.mxu0 %v5636_v29  ;;  %3698 = vmatprep.subr.bf16.mxu0 %v4946_v55  ;;  %v5086_v15 = vsub.f32 %v27_v52, %v1839_v24  ;;  %v1845_v29 = vand.u32 4294901760, %v29_v42  ;;  %v5100_v52 = vsub.f32 %v45_v2, %v1893_v49  ;;  %v5140_v36 = vld [vmem:[%s5404_s1 + $0xf0] sm:$0xff]  ;;  %v1851_v39 = vand.u32 4294901760, %v5127_v22 }
  0xdd   :  { %3688 = vmatpush3.bf16.msra.mxu1 %v5595_v33  ;;  %v5084_v33 = vpack.c.bf16 %v1839_v24, %v1836_v47  ;;  %5637 = vst [vmem:[#allocation4_spill] sm:$0xff] %v5086_v15  ;;  %5639 = vst [vmem:[#allocation6_spill] sm:$0xff] %v5100_v52  ;;  %v5640_v47 = vand.u32 4294901760, %v5018_v21  ;;  %v5113_v49 = vpack.c.bf16 %v1845_v29, %v1842_v28 }
  0xde   :  { %3690 = vmatprep.subr.bf16.mxu1 %v5596_v14  ;;  %3700 = vmatpush3.bf16.msra.mxu0 %v4948_v12  ;;  %v5098_v14 = vsub.f32 %v44_v44, %v1890_v53  ;;  %v1976_v53 = vsub.f32 %v5020_v1, %v5641_v59  ;;  %v5115_v44 = vsub.f32 %v28_v56, %v1842_v28  ;;  %v5643_v56 = vand.u32 4294901760, %v5055_v18  ;;  %v5145_v28 = vld [vmem:[%s5404_s1 + $0xf8] sm:$0xff] }
  0xdf   :  { %v1969_v24 = vsub.f32 %v5018_v21, %v5640_v47  ;;  %3702 = vmatprep.subr.bf16.mxu0 %v4979_v37  ;;  %v5117_v2 = vsub.f32 %v29_v42, %v1845_v29  ;;  %v1899_v47 = vand.u32 4294901760, %v47_v8  ;;  %v3737_v59 = vpack.c.bf16 %v2089_v51, %v2082_v27  ;;  %v33_v51 = vld [vmem:[%s5404_s1 + $0x78] sm:$0xff] }
  0xe0   :  { %5638 = vst [vmem:[#allocation5_spill] sm:$0xff] %v5098_v14  ;;  %v2102_v42 = vsub.f32 %v5055_v18, %v5643_v56  ;;  %v5502_v56 = vand.u32 4294901760, %v5098_v14  ;;  %v1977_v37 = vand.u32 4294901760, %v1976_v53  ;;  %v1905_v23 = vand.u32 4294901760, %v5145_v28 }
  0xe1   :  { %3692 = vmatpush3.bf16.msra.mxu1 %v5597_v26  ;;  %v5122_v26 = vld [vmem:[%s5404_s1 + $0x60] sm:$0xff]  ;;  %v1970_v29 = vand.u32 4294901760, %v1969_v24  ;;  %v1902_v24 = vand.u32 4294901760, %v5140_v36  ;;  %v5645_v53 = vand.u32 4294901760, %v5086_v15 }
  0xe2   :  { %3726 = vmatprep.subr.bf16.mxu1 %v4981_v0  ;;  %v2095_v0 = vsub.f32 %v5053_v16, %v5642_v32  ;;  %3704 = vmatpush3.bf16.msra.mxu0 %v4983_v25  ;;  %v5149_v32 = vsub.f32 %v46_v34, %v1896_v11  ;;  %v1848_v12 = vand.u32 4294901760, %v5122_v26  ;;  %v5160_v34 = vsub.f32 %v47_v8, %v1899_v47 }
  0xe3   :  { %3706 = vmatprep.subr.bf16.mxu0 %v5014_v3  ;;  %v2103_v27 = vand.u32 4294901760, %v2102_v42  ;;  %v5644_v8 = vand.u32 4294901760, %v5067_v4  ;;  %v2109_v3 = vsub.f32 %v5098_v14, %v5502_v56  ;;  %v5646_v25 = vand.u32 4294901760, %v5100_v52 }
  0xe4   :  { %1803 = vmatmul.mubr.f32.vlgmr.msra.gmra.mrb[10].mxu1 %v4779_v31  ;;  %v5158_v31 = vpack.c.bf16 %v1899_v47, %v1896_v11  ;;  %v1990_v47 = vsub.f32 %v5086_v15, %v5645_v53  ;;  %v5194_v53 = vsub.f32 %v5127_v22, %v1851_v39  ;;  %v5202_v42 = vsub.f32 %v5145_v28, %v1905_v23 }
  0xe5   :  { %3728 = vmatpush3.bf16.msra.mxu1 %v4985_v41  ;;  %v5167_v41 = vld [vmem:[%s5404_s1 + $0x70] sm:$0xff]  ;;  %2148 = vmatprep.mubr.f32.mxu1 %v5594_v63  ;;  %v1983_v11 = vsub.f32 %v5067_v4, %v5644_v8  ;;  %v2116_v63 = vsub.f32 %v5100_v52, %v5646_v25  ;;  %v5191_v8 = vsub.f32 %v5122_v26, %v1848_v12  ;;  %v2110_v14 = vand.u32 4294901760, %v2109_v3 }
  0xe6   :  { %3730 = vmatprep.subr.bf16.mxu1 %v5043_v20  ;;  %v2096_v20 = vand.u32 4294901760, %v2095_v0  ;;  %3708 = vmatpush3.bf16.msra.mxu0 %v5016_v54  ;;  %v1854_v56 = vand.u32 4294901760, %v5167_v41  ;;  %v1857_v54 = vand.u32 4294901760, %v33_v51  ;;  %v5199_v25 = vsub.f32 %v5140_v36, %v1902_v24 }
  0xe7   :  { %3710 = vmatprep.subr.bf16.mxu0 %v5051_v38  ;;  %v5515_v0 = vand.u32 4294901760, %v5160_v34  ;;  %v3739_v26 = vpack.c.bf16 %v1977_v37, %v1970_v29  ;;  %v1984_v52 = vand.u32 4294901760, %v1983_v11  ;;  %v1991_v22 = vand.u32 4294901760, %v1990_v47 }
  0xe8   :  { %v3741_v38 = vpack.c.bf16 %v2103_v27, %v2096_v20  ;;  %v2117_v15 = vand.u32 4294901760, %v2116_v63  ;;  %v5648_v4 = vand.u32 4294901760, %v5117_v2  ;;  %v5216_v37 = vsub.f32 %v5167_v41, %v1854_v56 }
  0xe9   :  { %3732 = vmatpush3.bf16.msra.mxu1 %v5065_v19  ;;  %v2122_v19 = vand.u32 4294901760, %v5149_v32  ;;  %v5218_v29 = vsub.f32 %v33_v51, %v1857_v54  ;;  %v2010_v3 = vand.u32 4294901760, %v5191_v8  ;;  %v2017_v63 = vand.u32 4294901760, %v5194_v53 }
  0xea   :  { %3734 = vmatprep.subr.bf16.mxu1 %v5088_v58  ;;  %3712 = vmatpush3.bf16.msra.mxu0 %v5084_v33  ;;  %v5647_v58 = vand.u32 4294901760, %v5115_v44  ;;  %v2004_v28 = vsub.f32 %v5117_v2, %v5648_v4  ;;  %v2130_v4 = vsub.f32 %v5160_v34, %v5515_v0  ;;  %v5517_v41 = vand.u32 4294901760, %v5202_v42 }
  0xeb   :  { %3714 = vmatprep.subr.bf16.mxu0 %v5090_v13  ;;  %v2123_v20 = vsub.f32 %v5149_v32, %v2122_v19  ;;  %v5230_v27 = vpack.c.bf16 %v1851_v39, %v1848_v12  ;;  %v5232_v51 = vpack.c.bf16 %v1905_v23, %v1902_v24  ;;  %v3743_v11 = vpack.c.bf16 %v1991_v22, %v1984_v52 }
  0xec   :  { %v1997_v36 = vsub.f32 %v5115_v44, %v5647_v58  ;;  %v2005_v58 = vand.u32 4294901760, %v2004_v28  ;;  %v2011_v0 = vsub.f32 %v5191_v8, %v2010_v3  ;;  %v2018_v39 = vsub.f32 %v5194_v53, %v2017_v63 }
  0xed   :  { %3736 = vmatpush3.bf16.msra.mxu1 %v5107_v17  ;;  %v5519_v17 = vand.u32 4294901760, %v5199_v25  ;;  %v5516_v12 = vand.u32 4294901760, %v5216_v37  ;;  %v5518_v23 = vand.u32 4294901760, %v5218_v29  ;;  %v2124_v52 = vand.u32 4294901760, %v2123_v20 }
  0xee   :  { %3738 = vmatprep.subr.bf16.mxu1 %v3737_v59  ;;  %3716 = vmatpush3.bf16.msra.mxu0 %v5113_v49  ;;  %v3745_v59 = vpack.c.bf16 %v2117_v15, %v2110_v14  ;;  %v1998_v47 = vand.u32 4294901760, %v1997_v36  ;;  %v2131_v15 = vand.u32 4294901760, %v2130_v4  ;;  %v2144_v24 = vsub.f32 %v5202_v42, %v5517_v41 }
  0xef   :  { %3718 = vmatprep.subr.bf16.mxu0 %v5158_v31  ;;  %v2137_v14 = vsub.f32 %v5199_v25, %v5519_v17  ;;  %v3757_v36 = vpack.c.bf16 %v4868_v62, %v4866_v57  ;;  %v2019_v28 = vand.u32 4294901760, %v2018_v39  ;;  %v2025_v20 = vsub.f32 %v5216_v37, %v5516_v12 }
  0xf0   :  { %v3747_v22 = vpack.c.bf16 %v2005_v58, %v1998_v47  ;;  %v2032_v4 = vsub.f32 %v5218_v29, %v5518_v23  ;;  %v2145_v47 = vand.u32 4294901760, %v2144_v24  ;;  %v3761_v58 = vpack.c.bf16 %v4908_v9, %v4906_v60  ;;  %v5649_v23 = vld [vmem:[#allocation29_spill] sm:$0xff] }
  0xf1   :  { %3740 = vmatpush3.bf16.msra.mxu1 %v3739_v26  ;;  %v5251_v26 = vpack.c.bf16 %v1857_v54, %v1854_v56  ;;  %v3749_v54 = vpack.c.bf16 %v2131_v15, %v2124_v52  ;;  %v2138_v56 = vand.u32 4294901760, %v2137_v14  ;;  %v2026_v39 = vand.u32 4294901760, %v2025_v20  ;;  %v5650_v52 = vld [vmem:[#allocation20_spill] sm:$0xff]  ;;  %v5654_v20 = vld [vmem:[#allocation9_spill] sm:$0xff] }
  0xf2   :  { %3742 = vmatprep.subr.bf16.mxu1 %v3741_v38  ;;  %3720 = vmatpush3.bf16.msra.mxu0 %v5230_v27  ;;  %v2012_v38 = vand.u32 4294901760, %v2011_v0  ;;  %v2033_v12 = vand.u32 4294901760, %v2032_v4  ;;  %v3765_v14 = vpack.c.bf16 %v4955_v43, %v4953_v48  ;;  %v3767_v24 = vpack.c.bf16 %v4970_v30, %v4964_v10  ;;  %v5655_v4 = vld [vmem:[#allocation5_spill] sm:$0xff] }
  0xf3   :  { %3722 = vmatprep.subr.bf16.mxu0 %v5232_v51  ;;  %v3753_v41 = vpack.c.bf16 %v2145_v47, %v2138_v56  ;;  %v5657_v47 = vld [vmem:[#allocation11_spill] sm:$0xff] }
  0xf4   :  { %v3751_v0 = vpack.c.bf16 %v2019_v28, %v2012_v38  ;;  %v3755_v15 = vpack.c.bf16 %v2033_v12, %v2026_v39  ;;  %v3771_v12 = vpack.c.bf16 %v5020_v1, %v5018_v21  ;;  %v5653_v38 = vld [vmem:[#allocation4_spill] sm:$0xff]  ;;  %v5659_v39 = vld [vmem:[#allocation15_spill] sm:$0xff] }
  0xf5   :  { %3744 = vmatpush3.bf16.msra.mxu1 %v3743_v11  ;;  %v3759_v11 = vpack.c.bf16 %v4878_v46, %v4876_v40 }
  0xf6   :  { %3746 = vmatprep.subr.bf16.mxu1 %v3745_v59  ;;  %3724 = vmatpush3.bf16.msra.mxu0 %v5251_v26  ;;  %v3763_v59 = vpack.c.bf16 %v4934_v50, %v4932_v6 }
  0xf7   :  { %3758 = vmatprep.subr.bf16.mxu0 %v3757_v36  ;;  %v5652_v36 = vld [vmem:[#allocation3_spill] sm:$0xff] }
  0xf8   :  { %v3775_v28 = vpack.c.bf16 %v5653_v38, %v5652_v36 }
  0xf9   :  { %3748 = vmatpush3.bf16.msra.mxu1 %v3747_v22  ;;  %1918 = vmatmul.mubr.f32.vlgmr.msra.gmra.mrb[12].mxu0 %v5649_v23  ;;  %v3769_v23 = vpack.c.bf16 %v5007_v5, %v4996_v61  ;;  %v5651_v22 = vld [vmem:[#allocation22_spill] sm:$0xff] }
  0xfa   :  { %3750 = vmatprep.subr.bf16.mxu1 %v3749_v54  ;;  %3760 = vmatpush3.bf16.msra.mxu0 %v3759_v11  ;;  %v5656_v54 = vld [vmem:[#allocation6_spill] sm:$0xff]  ;;  %v3779_v11 = vpack.c.bf16 %v5117_v2, %v5115_v44 }
  0xfb   :  { %2285 = vmatprep.mubr.f32.mxu0 %v5650_v52  ;;  %3762 = vmatprep.subr.bf16.mxu0 %v3761_v58  ;;  %v3777_v56 = vpack.c.bf16 %v5656_v54, %v5655_v4  ;;  %v3781_v58 = vpack.c.bf16 %v5160_v34, %v5149_v32  ;;  %v5691_v32 = vand.u32 4294901760, %v5202_v42 }
  0xfd   :  { %3752 = vmatpush3.bf16.msra.mxu1 %v3751_v0  ;;  %v5658_v0 = vld [vmem:[#allocation13_spill] sm:$0xff] }
  0xfe   :  { %3754 = vmatprep.subr.bf16.mxu1 %v3753_v41  ;;  %3764 = vmatpush3.bf16.msra.mxu0 %v3763_v59  ;;  %v3773_v41 = vpack.c.bf16 %v5055_v18, %v5053_v16 }
  0xff   :  { %3766 = vmatprep.subr.bf16.mxu0 %v3765_v14 }
 0x101   :  { %3756 = vmatpush3.bf16.msra.mxu1 %v3755_v15  ;;  %v3783_v15 = vpack.c.bf16 %v5194_v53, %v5191_v8 }
 0x102   :  { %3790 = vmatprep.subr.bf16.mxu1 %v4930_v35  ;;  %3768 = vmatpush3.bf16.msra.mxu0 %v3767_v24  ;;  %v5660_v24 = vld [vmem:[#allocation2_spill] sm:$0xff] }
 0x103   :  { %3770 = vmatprep.subr.bf16.mxu0 %v3769_v23  ;;  %v3785_v23 = vpack.c.bf16 %v5202_v42, %v5199_v25 }
 0x104   :  { %2150 = vmatmul.mubr.f32.vlgmr.msra.gmra.mrb[12].mxu1 %v4441_v7 }
 0x105   :  { %3792 = vmatpush3.bf16.msra.mxu1 %v4938_v45  ;;  %2392 = vmatprep.mubr.f32.mxu1 %v5651_v22  ;;  %v5662_v22 = vand.u32 4294901760, %v4866_v57  ;;  %v5667_v57 = vand.u32 4294901760, %v4908_v9  ;;  %v5673_v9 = vand.u32 4294901760, %v4955_v43  ;;  %v5679_v43 = vand.u32 4294901760, %v5018_v21 }
 0x106   :  { %3794 = vmatprep.subr.bf16.mxu1 %v4946_v55  ;;  %3772 = vmatpush3.bf16.msra.mxu0 %v3771_v12  ;;  %v5661_v12 = vld [vmem:[#allocation19_spill] sm:$0xff]  ;;  %v5684_v21 = vand.u32 4294901760, %v5653_v38 }
 0x107   :  { %3774 = vmatprep.subr.bf16.mxu0 %v3773_v41  ;;  %v3787_v41 = vpack.c.bf16 %v5218_v29, %v5216_v37 }
 0x109   :  { %3796 = vmatpush3.bf16.msra.mxu1 %v5654_v20 }
 0x10a   :  { %3798 = vmatprep.subr.bf16.mxu1 %v5657_v47  ;;  %3776 = vmatpush3.bf16.msra.mxu0 %v3775_v28  ;;  %v5663_v28 = vand.u32 4294901760, %v4868_v62 }
 0x10b   :  { %3778 = vmatprep.subr.bf16.mxu0 %v3777_v56  ;;  %v2711_v59 = vpop.f32.mrb[0].mxu0 }
 0x10c   :  { %v2712_v52 = vpop.f32.mrb[1].mxu0  ;;  %v3821_v56 = vpack.c.bf16 %v5663_v28, %v5662_v22  ;;  %v5668_v28 = vld [vmem:[#allocation23_spill] sm:$0xff] }
 0x10d   :  { %3800 = vmatpush3.bf16.msra.mxu1 %v5658_v0  ;;  %v2713_v14 = vadd.f32 %v2712_v52, %v2711_v59  ;;  %v5664_v59 = vand.u32 4294901760, %v4876_v40  ;;  %v5665_v52 = vand.u32 4294901760, %v4878_v46  ;;  %v5669_v40 = vand.u32 4294901760, %v4932_v6 }
 0x10e   :  { %3802 = vmatprep.subr.bf16.mxu1 %v5659_v39  ;;  %3780 = vmatpush3.bf16.msra.mxu0 %v3779_v11  ;;  %v5670_v46 = vand.u32 4294901760, %v4934_v50  ;;  %v5675_v6 = vand.u32 4294901760, %v4970_v30  ;;  %v5676_v50 = vand.u32 4294901760, %v4996_v61  ;;  %v5681_v30 = vand.u32 4294901760, %v5053_v16 }
 0x10f   :  { %3782 = vmatprep.subr.bf16.mxu0 %v3781_v58  ;;  %v5682_v61 = vand.u32 4294901760, %v5055_v18  ;;  %v5686_v16 = vand.u32 4294901760, %v5656_v54  ;;  %v5688_v18 = vand.u32 4294901760, %v5117_v2  ;;  %v5690_v2 = vand.u32 4294901760, %v5199_v25 }
 0x111   :  { %3804 = vmatpush3.bf16.msra.mxu1 %v5660_v24 }
 0x112   :  { %3806 = vmatprep.subr.bf16.mxu1 %v5661_v12  ;;  %3784 = vmatpush3.bf16.msra.mxu0 %v3783_v15  ;;  %v3823_v15 = vpack.c.bf16 %v5665_v52, %v5664_v59 }
 0x113   :  { %3786 = vmatprep.subr.bf16.mxu0 %v3785_v23  ;;  %v5666_v23 = vand.u32 4294901760, %v4906_v60  ;;  %v5672_v60 = vand.u32 4294901760, %v4953_v48  ;;  %v5678_v48 = vld [vmem:[#allocation25_spill] sm:$0xff] }
 0x115   :  { %3808 = vmatpush3.bf16.msra.mxu1 %v5084_v33  ;;  %v3825_v62 = vpack.c.bf16 %v5667_v57, %v5666_v23 }
 0x116   :  { %3810 = vmatprep.subr.bf16.mxu1 %v5090_v13  ;;  %3788 = vmatpush3.bf16.msra.mxu0 %v3787_v41  ;;  %v3827_v41 = vpack.c.bf16 %v5670_v46, %v5669_v40 }
 0x117   :  { %v2746_v11 = vpop.f32.mrb[0].mxu1  ;;  %3822 = vmatprep.subr.bf16.mxu0 %v3821_v56  ;;  %v3829_v56 = vpack.c.bf16 %v5673_v9, %v5672_v60 }
 0x118   :  { %v2747_v58 = vpop.f32.mrb[1].mxu1 }
 0x119   :  { %v2748_v17 = vadd.f32 %v2747_v58, %v2746_v11  ;;  %3812 = vmatpush3.bf16.msra.mxu1 %v5113_v49  ;;  %2288 = vmatmul.mubr.f32.vlgmr.msra.gmra.mrb[14].mxu0 %v5668_v28  ;;  %v5671_v11 = vld [vmem:[#allocation16_spill] sm:$0xff]  ;;  %v5677_v58 = vand.u32 4294901760, %v5007_v5 }
 0x11a   :  { %3814 = vmatprep.subr.bf16.mxu1 %v5158_v31  ;;  %3824 = vmatpush3.bf16.msra.mxu0 %v3823_v15  ;;  %v3837_v15 = vpack.c.bf16 %v5682_v61, %v5681_v30 }
 0x11b   :  { %v423_v22 = vadd.f32 %v2748_v17, %v2713_v14  ;;  %2562 = vmatprep.mubr.f32.mxu0 %v5671_v11  ;;  %3826 = vmatprep.subr.bf16.mxu0 %v3825_v62  ;;  %v5674_v17 = vand.u32 4294901760, %v4964_v10  ;;  %v3833_v59 = vpack.c.bf16 %v5677_v58, %v5676_v50  ;;  %v5680_v10 = vand.u32 4294901760, %v5020_v1 }
 0x11d   :  { %3816 = vmatpush3.bf16.msra.mxu1 %v5230_v27  ;;  %v3831_v14 = vpack.c.bf16 %v5675_v6, %v5674_v17  ;;  %v3835_v52 = vpack.c.bf16 %v5680_v10, %v5679_v43 }
 0x11e   :  { %3818 = vmatprep.subr.bf16.mxu1 %v5232_v51  ;;  %3828 = vmatpush3.bf16.msra.mxu0 %v3827_v41 }
 0x11f   :  { %3830 = vmatprep.subr.bf16.mxu0 %v3829_v56 }
 0x121   :  { %3820 = vmatpush3.bf16.msra.mxu1 %v5251_v26 }
 0x122   :  { %3854 = vmatprep.subr.bf16.mxu1 %v4930_v35  ;;  %3832 = vmatpush3.bf16.msra.mxu0 %v3831_v14  ;;  %v5683_v35 = vand.u32 4294901760, %v5652_v36  ;;  %v5689_v36 = vand.u32 4294901760, %v5160_v34  ;;  %v3849_v34 = vpack.c.bf16 %v5691_v32, %v5690_v2 }
 0x123   :  { %3834 = vmatprep.subr.bf16.mxu0 %v3833_v59 }
 0x124   :  { %2396 = vmatmul.mubr.f32.vlgmr.msra.gmra.mrb[14].mxu1 %v5678_v48  ;;  %v3839_v5 = vpack.c.bf16 %v5684_v21, %v5683_v35  ;;  %v3845_v38 = vpack.c.bf16 %v5689_v36, %v2122_v19 }
 0x125   :  { %3856 = vmatpush3.bf16.msra.mxu1 %v4938_v45  ;;  %2666 = vmatprep.mubr.f32.mxu1 %v5671_v11  ;;  %v5685_v45 = vand.u32 4294901760, %v5655_v4 }
 0x126   :  { %3858 = vmatprep.subr.bf16.mxu1 %v4946_v55  ;;  %3836 = vmatpush3.bf16.msra.mxu0 %v3835_v52  ;;  %v5687_v55 = vand.u32 4294901760, %v5115_v44  ;;  %v3847_v44 = vpack.c.bf16 %v2017_v63, %v2010_v3 }
 0x127   :  { %3838 = vmatprep.subr.bf16.mxu0 %v3837_v15  ;;  %v3841_v1 = vpack.c.bf16 %v5686_v16, %v5685_v45 }
 0x128   :  { %v3843_v23 = vpack.c.bf16 %v5688_v18, %v5687_v55 }
 0x129   :  { %3860 = vmatpush3.bf16.msra.mxu1 %v5654_v20 }
 0x12a   :  { %3862 = vmatprep.subr.bf16.mxu1 %v5657_v47  ;;  %3840 = vmatpush3.bf16.msra.mxu0 %v3839_v5  ;;  %v5692_v47 = vand.u32 4294901760, %v5216_v37 }
 0x12b   :  { %3842 = vmatprep.subr.bf16.mxu0 %v3841_v1 }
 0x12c   :  { %v2781_v20 = vpop.f32.mrb[2].mxu0 }
 0x12d   :  { %3864 = vmatpush3.bf16.msra.mxu1 %v5658_v0  ;;  %v2782_v4 = vpop.f32.mrb[3].mxu0  ;;  %v5693_v0 = vand.u32 4294901760, %v5218_v29 }
 0x12e   :  { %3866 = vmatprep.subr.bf16.mxu1 %v5659_v39  ;;  %v2783_v54 = vadd.f32 %v2782_v4, %v2781_v20  ;;  %3844 = vmatpush3.bf16.msra.mxu0 %v3843_v23 }
 0x12f   :  { %3846 = vmatprep.subr.bf16.mxu0 %v3845_v38  ;;  %v3851_v8 = vpack.c.bf16 %v5693_v0, %v5692_v47 }
 0x130   :  { %v561_v19 = vadd.f32 %v2783_v54, %v423_v22 }
 0x131   :  { %3868 = vmatpush3.bf16.msra.mxu1 %v5660_v24 }
 0x132   :  { %3870 = vmatprep.subr.bf16.mxu1 %v5661_v12  ;;  %3848 = vmatpush3.bf16.msra.mxu0 %v3847_v44 }
 0x133   :  { %3850 = vmatprep.subr.bf16.mxu0 %v3849_v34 }
 0x135   :  { %3872 = vmatpush3.bf16.msra.mxu1 %v5084_v33 }
 0x136   :  { %3874 = vmatprep.subr.bf16.mxu1 %v5090_v13  ;;  %3852 = vmatpush3.bf16.msra.mxu0 %v3851_v8 }
 0x137   :  { %v2816_v53 = vpop.f32.mrb[2].mxu1 }
 0x138   :  { %v2817_v3 = vpop.f32.mrb[3].mxu1 }
 0x139   :  { %v2818_v25 = vadd.f32 %v2817_v3, %v2816_v53  ;;  %3876 = vmatpush3.bf16.msra.mxu1 %v5113_v49  ;;  %2564 = vmatmul.mubr.f32.vlgmr.msra.gmra.mrb[16].mxu0 %v4441_v7 }
 0x13a   :  { %3878 = vmatprep.subr.bf16.mxu1 %v5158_v31 }
 0x13b   :  { %v669_v42 = vadd.f32 %v2818_v25, %v561_v19 }
 0x13d   :  { %3880 = vmatpush3.bf16.msra.mxu1 %v5230_v27 }
 0x13e   :  { %3882 = vmatprep.subr.bf16.mxu1 %v5232_v51 }
 0x141   :  { %3884 = vmatpush3.bf16.msra.mxu1 %v5251_v26 }
 0x144   :  { %2668 = vmatmul.mubr.f32.vlgmr.msra.gmra.mrb[16].mxu1 %v4441_v7 }
 0x14c   :  { %v2851_v13 = vpop.f32.mrb[4].mxu0 }
 0x14d   :  { %v2852_v33 = vpop.f32.mrb[5].mxu0 }
 0x14e   :  { %v2853_v37 = vadd.f32 %v2852_v33, %v2851_v13 }
 0x150   :  { %v837_v29 = vadd.f32 %v2853_v37, %v669_v42 }
 0x157   :  { %v2886_v63 = vpop.f32.mrb[4].mxu1 }
 0x158   :  { %v2887_v39 = vpop.f32.mrb[5].mxu1 }
 0x159   :  { %v2888_v49 = vadd.f32 %v2887_v39, %v2886_v63 }
 0x15b   :  { %v941_v24 = vadd.f32 %v2888_v49, %v837_v29 }
 0x15d   :  { %v1808_v59 = vmul.f32 %v941_v24, %v941_v24 }
 0x16c   :  { %v2921_v31 = vpop.f32.mrb[6].mxu0 }
 0x16d   :  { %v2922_v12 = vpop.f32.mrb[7].mxu0 }
 0x16e   :  { %v2923_v57 = vadd.f32 %v2922_v12, %v2921_v31 }
 0x177   :  { %v2956_v62 = vpop.f32.mrb[6].mxu1 }
 0x178   :  { %v2957_v22 = vpop.f32.mrb[7].mxu1 }
 0x179   :  { %v2958_v27 = vadd.f32 %v2957_v22, %v2956_v62 }
 0x17b   :  { %v1287_v28 = vadd.f32 %v2958_v27, %v2923_v57 }
 0x18c   :  { %v2991_v51 = vpop.f32.mrb[8].mxu0 }
 0x18d   :  { %v2992_v40 = vpop.f32.mrb[9].mxu0 }
 0x18e   :  { %v2993_v26 = vadd.f32 %v2992_v40, %v2991_v51 }
 0x190   :  { %v1425_v46 = vadd.f32 %v2993_v26, %v1287_v28 }
 0x197   :  { %v3026_v7 = vpop.f32.mrb[8].mxu1 }
 0x198   :  { %v3027_v41 = vpop.f32.mrb[9].mxu1 }
 0x199   :  { %v3028_v11 = vadd.f32 %v3027_v41, %v3026_v7 }
 0x19b   :  { %v1533_v60 = vadd.f32 %v3028_v11, %v1425_v46 }
 0x1ac   :  { %v3061_v9 = vpop.f32.mrb[10].mxu0 }
 0x1ad   :  { %v3062_v56 = vpop.f32.mrb[11].mxu0 }
 0x1ae   :  { %v3063_v17 = vadd.f32 %v3062_v56, %v3061_v9 }
 0x1b0   :  { %v1701_v6 = vadd.f32 %v3063_v17, %v1533_v60 }
 0x1b7   :  { %v3096_v14 = vpop.f32.mrb[10].mxu1 }
 0x1b8   :  { %v3097_v50 = vpop.f32.mrb[11].mxu1 }
 0x1b9   :  { %v3098_v58 = vadd.f32 %v3097_v50, %v3096_v14 }
 0x1bb   :  { %v1805_v48 = vadd.f32 %v3098_v58, %v1701_v6 }
 0x1bd   :  { %v1809_v43 = vsub.f32 %v1805_v48, %v1808_v59 }
 0x1bf   :  { %v1810_v30 = vmul.f32 1.0125, %v1809_v43 }
 0x1cc   :  { %v3131_v10 = vpop.f32.mrb[12].mxu0 }
 0x1cd   :  { %v3132_v52 = vpop.f32.mrb[13].mxu0 }
 0x1ce   :  { %v3133_v61 = vadd.f32 %v3132_v52, %v3131_v10 }
 0x1d0   :  { %v1920_v15 = vadd.f32 %v3133_v61, %v1810_v30 }
 0x1d7   :  { %v3166_v35 = vpop.f32.mrb[12].mxu1 }
 0x1d8   :  { %v3167_v21 = vpop.f32.mrb[13].mxu1 }
 0x1d9   :  { %v3168_v5 = vadd.f32 %v3167_v21, %v3166_v35 }
 0x1db   :  { %v2152_v45 = vadd.f32 %v3168_v5, %v1920_v15 }
 0x1ec   :  { %v3201_v16 = vpop.f32.mrb[14].mxu0 }
 0x1ed   :  { %v3202_v1 = vpop.f32.mrb[15].mxu0 }
 0x1ee   :  { %v3203_v55 = vadd.f32 %v3202_v1, %v3201_v16 }
 0x1f0   :  { %v2290_v18 = vadd.f32 %v3203_v55, %v2152_v45 }
 0x1f7   :  { %v3236_v23 = vpop.f32.mrb[14].mxu1 }
 0x1f8   :  { %v3237_v36 = vpop.f32.mrb[15].mxu1 }
 0x1f9   :  { %v3238_v38 = vadd.f32 %v3237_v36, %v3236_v23 }
 0x1fb   :  { %v2398_v20 = vadd.f32 %v3238_v38, %v2290_v18 }
 0x20c   :  { %v3271_v4 = vpop.f32.mrb[16].mxu0 }
 0x20d   :  { %v3272_v54 = vpop.f32.mrb[17].mxu0 }
 0x20e   :  { %v3273_v44 = vadd.f32 %v3272_v54, %v3271_v4 }
 0x210   :  { %v2566_v2 = vadd.f32 %v3273_v44, %v2398_v20 }
 0x217   :  { %v3306_v32 = vpop.f32.mrb[16].mxu1 }
 0x218   :  { %v3307_v34 = vpop.f32.mrb[17].mxu1 }
 0x219   :  { %v3308_v19 = vadd.f32 %v3307_v34, %v3306_v32 }
 0x21b   :  { %v2670_v47 = vadd.f32 %v3308_v19, %v2566_v2 }
 0x21d   :  { %2674 = vst.msk [vmem:[%s5405_s3] sm:$0xff] %vm2673_vm0, %v2670_v47 }

</bundles_post_ra>
